<compile_context>
chip_gen: v7x
topology: tpu7x:2x2x1
jax: 0.10.0
libtpu: 0.0.40
codegen_flags: <defaults>
</compile_context>

<pallas_src>
import jax
import jax.numpy as jnp
from jax.experimental import pallas as pl
from jax.experimental.pallas import tpu as pltpu

N_CH = 10                       # out_channels of the first conv in every branch
K_SIZES = (3, 6, 9)
PADDINGS = (1, 3, 4)
KMAX = max(K_SIZES)
MAXPAD = max(PADDINGS)          # single shared input pad; per-branch tap offsets
BN_EPS = 1e-5


def make_t6cnn_kernel(L, C, pool):
    """Fused conv1/bn/relu -> conv2/bn/relu -> maxpool -> MLP kernel (static shapes)."""
    f32 = jnp.float32

    def kernel(x_ref, w1_ref, b1_ref, w2_ref, b2_ref,
               wm1_ref, bm1_ref, wm2_ref, bm2_ref, out_ref):
        xp = x_ref[0]                                   # (1, L + 2*MAXPAD)
        hid = bm1_ref[...]                              # (64, 1); start from MLP-layer-1 bias

        for i, (K, P) in enumerate(zip(K_SIZES, PADDINGS)):
            L1 = L + 2 * P - K + 1                      # conv1 output length
            L2 = L1 + 2 * P - K + 1                     # conv2 output length
            start = MAXPAD - P                          # tap offset inside the shared pad

            # ---- Conv1d(1->10) + folded BN1 + ReLU (shift-and-accumulate on the VPU) ----
            h = None
            for k in range(K):
                xs = xp[:, start + k:start + k + L1]    # (1, L1)
                t = w1_ref[i * KMAX + k] * xs           # (10,1)*(1,L1) -> (10, L1)
                h = t if h is None else h + t
            h = jnp.maximum(h + b1_ref[i], 0.0)         # (10, L1)

            # ---- zero-pad, im2col, Conv1d(10->C) + folded BN2 as ONE MXU matmul ----
            zp = jnp.zeros((N_CH, P), f32)
            h_pad = jnp.concatenate([zp, h, zp], axis=1)                         # (10, L1+2P)
            hc = jnp.concatenate([h_pad[:, k:k + L2] for k in range(K)], axis=0)  # (10K, L2)
            y = jnp.dot(w2_ref[i][:, :N_CH * K], hc,
                        preferred_element_type=f32)                              # (C, L2)
            y = jnp.maximum(y + b2_ref[i], 0.0)

            # ---- MaxPool1d(pool): exactly one output position (covers columns [0, pool)) ----
            pooled = jnp.max(y[:, :pool], axis=1, keepdims=True)                 # (C, 1)

            # ---- this branch's slice of the first MLP layer: single matmul ----
            hid = hid + jnp.dot(wm1_ref[i], pooled, preferred_element_type=f32)  # (64, 1)

        h1 = jnp.maximum(hid, 0.0)                                               # ReLU
        out_ref[0] = (jnp.dot(wm2_ref[...], h1, preferred_element_type=f32)
                      + bm2_ref[...])                                            # (2, 1)

    return kernel


def init_params(key, in_dim):
    """Deterministic synthetic parameters matching the PyTorch module's shapes."""
    C = min(in_dim, 800)
    keys = iter(jax.random.split(key, 48))
    p = {"C": C, "pool": in_dim}
    for i, K in enumerate(K_SIZES, start=1):
        p[f"c1w{i}"] = 0.4 * jax.random.normal(next(keys), (N_CH, 1, K), jnp.float32)
        p[f"c1b{i}"] = 0.1 * jax.random.normal(next(keys), (N_CH,), jnp.float32)
        p[f"bn1g{i}"] = 1.0 + 0.1 * jax.random.normal(next(keys), (N_CH,), jnp.float32)
        p[f"bn1b{i}"] = 0.1 * jax.random.normal(next(keys), (N_CH,), jnp.float32)
        p[f"bn1m{i}"] = 0.1 * jax.random.normal(next(keys), (N_CH,), jnp.float32)
        p[f"bn1v{i}"] = jax.random.uniform(next(keys), (N_CH,), jnp.float32, 0.5, 1.5)
        p[f"c2w{i}"] = 0.2 * jax.random.normal(next(keys), (C, N_CH, K), jnp.float32)
        p[f"c2b{i}"] = 0.1 * jax.random.normal(next(keys), (C,), jnp.float32)
        p[f"bn2g{i}"] = 1.0 + 0.1 * jax.random.normal(next(keys), (C,), jnp.float32)
        p[f"bn2b{i}"] = 0.1 * jax.random.normal(next(keys), (C,), jnp.float32)
        p[f"bn2m{i}"] = 0.1 * jax.random.normal(next(keys), (C,), jnp.float32)
        p[f"bn2v{i}"] = jax.random.uniform(next(keys), (C,), jnp.float32, 0.5, 1.5)
    p["l1w"] = 0.1 * jax.random.normal(next(keys), (64, 3 * C), jnp.float32)
    p["l1b"] = 0.1 * jax.random.normal(next(keys), (64,), jnp.float32)
    p["l2w"] = 0.2 * jax.random.normal(next(keys), (2, 64), jnp.float32)
    p["l2b"] = 0.1 * jax.random.normal(next(keys), (2,), jnp.float32)
    return p


def t6cnn_forward(x, params):
    """Fold BN + bias into conv weights, stack per-branch params, call the kernel."""
    B, L = x.shape
    C, pool = params["C"], params["pool"]
    assert L == pool, "T6CNN is applied to inputs of length in_dim"
    for K, P in zip(K_SIZES, PADDINGS):
        L2 = (L + 2 * P - K + 1) + 2 * P - K + 1
        assert pool <= L2 < 2 * pool, "MaxPool1d must produce exactly one position"

    Lxp = L + 2 * MAXPAD
    x_pad = jnp.pad(x.astype(jnp.float32), ((0, 0), (MAXPAD, MAXPAD))).reshape(B, 1, Lxp)

    # ---- fold BN (running stats) + conv bias into conv weights, stack the 3 branches ----
    w1_stack = jnp.zeros((3 * KMAX, N_CH, 1), jnp.float32)
    b1_stack = jnp.zeros((3, N_CH, 1), jnp.float32)
    w2_stack = jnp.zeros((3, C, N_CH * KMAX), jnp.float32)
    b2_stack = jnp.zeros((3, C, 1), jnp.float32)
    wm1_stack = jnp.zeros((3, 64, C), jnp.float32)
    for i, K in enumerate(K_SIZES):
        j = i + 1
        s1 = params[f"bn1g{j}"] / jnp.sqrt(params[f"bn1v{j}"] + BN_EPS)            # (10,)
        w1e = params[f"c1w{j}"][:, 0, :] * s1[:, None]                             # (10, K)
        b1e = params[f"c1b{j}"] * s1 + params[f"bn1b{j}"] - params[f"bn1m{j}"] * s1
        w1_stack = w1_stack.at[i * KMAX:i * KMAX + K].set(w1e.T[:, :, None])
        b1_stack = b1_stack.at[i].set(b1e[:, None])

        s2 = params[f"bn2g{j}"] / jnp.sqrt(params[f"bn2v{j}"] + BN_EPS)            # (C,)
        w2e = params[f"c2w{j}"] * s2[:, None, None]                                # (C, 10, K)
        b2e = params[f"c2b{j}"] * s2 + params[f"bn2b{j}"] - params[f"bn2m{j}"] * s2
        # im2col column k*10+ci multiplies h_pad[ci, l+k]
        w2_stack = w2_stack.at[i, :, :K * N_CH].set(
            jnp.transpose(w2e, (0, 2, 1)).reshape(C, K * N_CH))
        b2_stack = b2_stack.at[i].set(b2e[:, None])
        # Flatten order: [branch0 ch0..C-1, branch1 ..., branch2 ...]
        wm1_stack = wm1_stack.at[i].set(params["l1w"][:, i * C:(i + 1) * C])       # (64, C)

    bm1 = params["l1b"].reshape(64, 1)
    wm2 = params["l2w"]                       # (2, 64)
    bm2 = params["l2b"].reshape(2, 1)

    def replicated(arr):
        nd = arr.ndim
        return pl.BlockSpec(arr.shape, lambda b, nd=nd: (0,) * nd)

    kernel = make_t6cnn_kernel(L, C, pool)
    out = pl.pallas_call(
        kernel,
        out_shape=jax.ShapeDtypeStruct((B, 2, 1), jnp.float32),
        grid=(B,),
        in_specs=[
            pl.BlockSpec((1, 1, Lxp), lambda b: (b, 0, 0)),
            replicated(w1_stack), replicated(b1_stack),
            replicated(w2_stack), replicated(b2_stack),
            replicated(wm1_stack), replicated(bm1),
            replicated(wm2), replicated(bm2),
        ],
        out_specs=pl.BlockSpec((1, 2, 1), lambda b: (b, 0, 0)),
        compiler_params=pltpu.CompilerParams(
            dimension_semantics=("parallel",),
            vmem_limit_bytes=48 * 1024 * 1024),
    )(x_pad, w1_stack, b1_stack, w2_stack, b2_stack, wm1_stack, bm1, wm2, bm2)
    return out.reshape(B, 2)


def t6cnn_reference(x, params):
    """Independent plain-JAX reference (lax.conv) used only for verification."""
    B, L = x.shape
    C, pool = params["C"], params["pool"]
    xin = x[:, None, :]
    feats = []
    for i, (K, P) in enumerate(zip(K_SIZES, PADDINGS), start=1):
        h = jax.lax.conv_general_dilated(
            xin, params[f"c1w{i}"], (1,), [(P, P)],
            dimension_numbers=("NCH", "OIH", "NCH"),
            precision=jax.lax.Precision.HIGHEST) + params[f"c1b{i}"][None, :, None]
        h = ((h - params[f"bn1m{i}"][None, :, None])
             / jnp.sqrt(params[f"bn1v{i}"][None, :, None] + BN_EPS)
             * params[f"bn1g{i}"][None, :, None] + params[f"bn1b{i}"][None, :, None])
        h = jnp.maximum(h, 0.0)
        y = jax.lax.conv_general_dilated(
            h, params[f"c2w{i}"], (1,), [(P, P)],
            dimension_numbers=("NCH", "OIH", "NCH"),
            precision=jax.lax.Precision.HIGHEST) + params[f"c2b{i}"][None, :, None]
        y = ((y - params[f"bn2m{i}"][None, :, None])
             / jnp.sqrt(params[f"bn2v{i}"][None, :, None] + BN_EPS)
             * params[f"bn2g{i}"][None, :, None] + params[f"bn2b{i}"][None, :, None])
        y = jnp.maximum(y, 0.0)
        feats.append(jnp.max(y[:, :, :pool], axis=-1))            # MaxPool1d(pool) -> length 1
    flat = jnp.concatenate(feats, axis=1)                          # (B, 3C)
    h1 = jnp.maximum(jnp.dot(flat, params["l1w"].T,
                             precision=jax.lax.Precision.HIGHEST) + params["l1b"], 0.0)
    return jnp.dot(h1, params["l2w"].T,
                   precision=jax.lax.Precision.HIGHEST) + params["l2b"]


if __name__ == "__main__":
    # Small shapes: in_dim = 32 -> C = 32, MLP Linear(96, 64) -> Linear(64, 2); batch = 4.
    in_dim, B = 32, 4
    key = jax.random.PRNGKey(0)
    k_params, k_x = jax.random.split(key)
    params = init_params(k_params, in_dim)
    x = jax.random.normal(k_x, (B, in_dim), jnp.float32)

    out = jax.block_until_ready(t6cnn_forward(x, params))
    ref = jax.block_until_ready(t6cnn_reference(x, params))

    assert out.shape == (B, 2)
    assert jnp.allclose(out, ref, rtol=2e-3, atol=2e-3), (out, ref)
    print("KERNEL_OK")
</pallas_src>

<mosaic_0001>
module attributes {stable_mosaic.version = 11 : i64} {
  func.func @kernel(%arg0: i32, %arg1: memref<1x1x40xf32, #tpu.memory_space<vmem>>, %arg2: memref<27x10x1xf32, #tpu.memory_space<vmem>>, %arg3: memref<3x10x1xf32, #tpu.memory_space<vmem>>, %arg4: memref<3x32x90xf32, #tpu.memory_space<vmem>>, %arg5: memref<3x32x1xf32, #tpu.memory_space<vmem>>, %arg6: memref<3x64x32xf32, #tpu.memory_space<vmem>>, %arg7: memref<64x1xf32, #tpu.memory_space<vmem>>, %arg8: memref<2x64xf32, #tpu.memory_space<vmem>>, %arg9: memref<2x1xf32, #tpu.memory_space<vmem>>, %arg10: memref<1x2x1xf32, #tpu.memory_space<vmem>>) attributes {dimension_semantics = [#tpu.dimension_semantics<parallel>], iteration_bounds = array<i64: 4>, scalar_prefetch = 0 : i64, scratch_operands = 0 : i64, tpu.core_type = #tpu.core_type<tc>, window_params = [{transform_indices = @transform_0, window_bounds = array<i64: 1, 1, 40>}, {pipeline_mode = #tpu.pipeline_mode<synchronous>, transform_indices = @transform_1, window_bounds = array<i64: 27, 10, 1>}, {pipeline_mode = #tpu.pipeline_mode<synchronous>, transform_indices = @transform_2, window_bounds = array<i64: 3, 10, 1>}, {pipeline_mode = #tpu.pipeline_mode<synchronous>, transform_indices = @transform_3, window_bounds = array<i64: 3, 32, 90>}, {pipeline_mode = #tpu.pipeline_mode<synchronous>, transform_indices = @transform_4, window_bounds = array<i64: 3, 32, 1>}, {pipeline_mode = #tpu.pipeline_mode<synchronous>, transform_indices = @transform_5, window_bounds = array<i64: 3, 64, 32>}, {pipeline_mode = #tpu.pipeline_mode<synchronous>, transform_indices = @transform_6, window_bounds = array<i64: 64, 1>}, {pipeline_mode = #tpu.pipeline_mode<synchronous>, transform_indices = @transform_7, window_bounds = array<i64: 2, 64>}, {pipeline_mode = #tpu.pipeline_mode<synchronous>, transform_indices = @transform_8, window_bounds = array<i64: 2, 1>}, {transform_indices = @transform_9, window_bounds = array<i64: 1, 2, 1>}]} {
    %c0 = arith.constant 0 : index
    %c0_0 = arith.constant 0 : index
    %c0_1 = arith.constant 0 : index
    %0 = vector.load %arg1[%c0, %c0_0, %c0_1] : memref<1x1x40xf32, #tpu.memory_space<vmem>>, vector<1x1x40xf32>
    %1 = vector.shape_cast %0 : vector<1x1x40xf32> to vector<1x40xf32>
    %c0_2 = arith.constant 0 : index
    %c0_3 = arith.constant 0 : index
    %2 = vector.load %arg7[%c0_2, %c0_3] : memref<64x1xf32, #tpu.memory_space<vmem>>, vector<64x1xf32>
    %3 = vector.extract_strided_slice %1 {offsets = [0, 3], sizes = [1, 32], strides = [1, 1]} : vector<1x40xf32> to vector<1x32xf32>
    %c0_4 = arith.constant 0 : index
    %c0_5 = arith.constant 0 : index
    %c0_6 = arith.constant 0 : index
    %4 = vector.load %arg2[%c0_4, %c0_5, %c0_6] : memref<27x10x1xf32, #tpu.memory_space<vmem>>, vector<1x10x1xf32>
    %5 = vector.shape_cast %4 : vector<1x10x1xf32> to vector<10x1xf32>
    %6 = vector.broadcast %5 : vector<10x1xf32> to vector<10x32xf32>
    %7 = vector.broadcast %3 : vector<1x32xf32> to vector<10x32xf32>
    %8 = arith.mulf %6, %7 : vector<10x32xf32>
    %9 = vector.extract_strided_slice %1 {offsets = [0, 4], sizes = [1, 32], strides = [1, 1]} : vector<1x40xf32> to vector<1x32xf32>
    %c1 = arith.constant 1 : index
    %c0_7 = arith.constant 0 : index
    %c0_8 = arith.constant 0 : index
    %10 = vector.load %arg2[%c1, %c0_7, %c0_8] : memref<27x10x1xf32, #tpu.memory_space<vmem>>, vector<1x10x1xf32>
    %11 = vector.shape_cast %10 : vector<1x10x1xf32> to vector<10x1xf32>
    %12 = vector.broadcast %11 : vector<10x1xf32> to vector<10x32xf32>
    %13 = vector.broadcast %9 : vector<1x32xf32> to vector<10x32xf32>
    %14 = arith.mulf %12, %13 : vector<10x32xf32>
    %15 = arith.addf %8, %14 : vector<10x32xf32>
    %16 = vector.extract_strided_slice %1 {offsets = [0, 5], sizes = [1, 32], strides = [1, 1]} : vector<1x40xf32> to vector<1x32xf32>
    %c2 = arith.constant 2 : index
    %c0_9 = arith.constant 0 : index
    %c0_10 = arith.constant 0 : index
    %17 = vector.load %arg2[%c2, %c0_9, %c0_10] : memref<27x10x1xf32, #tpu.memory_space<vmem>>, vector<1x10x1xf32>
    %18 = vector.shape_cast %17 : vector<1x10x1xf32> to vector<10x1xf32>
    %19 = vector.broadcast %18 : vector<10x1xf32> to vector<10x32xf32>
    %20 = vector.broadcast %16 : vector<1x32xf32> to vector<10x32xf32>
    %21 = arith.mulf %19, %20 : vector<10x32xf32>
    %22 = arith.addf %15, %21 : vector<10x32xf32>
    %c0_11 = arith.constant 0 : index
    %c0_12 = arith.constant 0 : index
    %c0_13 = arith.constant 0 : index
    %23 = vector.load %arg3[%c0_11, %c0_12, %c0_13] : memref<3x10x1xf32, #tpu.memory_space<vmem>>, vector<1x10x1xf32>
    %24 = vector.shape_cast %23 : vector<1x10x1xf32> to vector<10x1xf32>
    %25 = vector.broadcast %24 : vector<10x1xf32> to vector<10x32xf32>
    %26 = arith.addf %22, %25 : vector<10x32xf32>
    %cst = arith.constant 0.000000e+00 : f32
    %27 = vector.broadcast %cst : f32 to vector<10x32xf32>
    %28 = arith.maximumf %26, %27 : vector<10x32xf32>
    %cst_14 = arith.constant 0.000000e+00 : f32
    %29 = vector.broadcast %cst_14 : f32 to vector<10x1xf32>
    %30 = tpu.concatenate %29, %28, %29 in 1 : vector<10x1xf32>, vector<10x32xf32>, vector<10x1xf32> -> vector<10x34xf32>
    %31 = vector.extract_strided_slice %30 {offsets = [0, 0], sizes = [10, 32], strides = [1, 1]} : vector<10x34xf32> to vector<10x32xf32>
    %32 = vector.extract_strided_slice %30 {offsets = [0, 1], sizes = [10, 32], strides = [1, 1]} : vector<10x34xf32> to vector<10x32xf32>
    %33 = vector.extract_strided_slice %30 {offsets = [0, 2], sizes = [10, 32], strides = [1, 1]} : vector<10x34xf32> to vector<10x32xf32>
    %34 = tpu.concatenate %31, %32, %33 in 0 : vector<10x32xf32>, vector<10x32xf32>, vector<10x32xf32> -> vector<30x32xf32>
    %c0_15 = arith.constant 0 : index
    %c0_16 = arith.constant 0 : index
    %c0_17 = arith.constant 0 : index
    %35 = vector.load %arg4[%c0_15, %c0_16, %c0_17] : memref<3x32x90xf32, #tpu.memory_space<vmem>>, vector<1x32x90xf32>
    %36 = vector.shape_cast %35 : vector<1x32x90xf32> to vector<32x90xf32>
    %37 = vector.extract_strided_slice %36 {offsets = [0, 0], sizes = [32, 30], strides = [1, 1]} : vector<32x90xf32> to vector<32x30xf32>
    %cst_18 = arith.constant dense<0.000000e+00> : vector<32x32xf32>
    %38 = tpu.matmul %37, %34, %cst_18 {dimension_numbers = #tpu.dot_dimension_numbers<[1], [0], [0], [1], [0, 0, 1, 1], [], []>} : vector<32x30xf32>, vector<30x32xf32>, vector<32x32xf32> -> vector<32x32xf32>
    %c0_19 = arith.constant 0 : index
    %c0_20 = arith.constant 0 : index
    %c0_21 = arith.constant 0 : index
    %39 = vector.load %arg5[%c0_19, %c0_20, %c0_21] : memref<3x32x1xf32, #tpu.memory_space<vmem>>, vector<1x32x1xf32>
    %40 = vector.shape_cast %39 : vector<1x32x1xf32> to vector<32x1xf32>
    %41 = vector.broadcast %40 : vector<32x1xf32> to vector<32x32xf32>
    %42 = arith.addf %38, %41 : vector<32x32xf32>
    %cst_22 = arith.constant 0.000000e+00 : f32
    %43 = vector.broadcast %cst_22 : f32 to vector<32x32xf32>
    %44 = arith.maximumf %42, %43 : vector<32x32xf32>
    %cst_23 = arith.constant dense<0xFF800000> : vector<32xf32>
    %45 = vector.multi_reduction <maximumf>, %44, %cst_23 [1] : vector<32x32xf32> to vector<32xf32>
    %46 = vector.shape_cast %45 : vector<32xf32> to vector<32x1xf32>
    %c0_24 = arith.constant 0 : index
    %c0_25 = arith.constant 0 : index
    %c0_26 = arith.constant 0 : index
    %47 = vector.load %arg6[%c0_24, %c0_25, %c0_26] : memref<3x64x32xf32, #tpu.memory_space<vmem>>, vector<1x64x32xf32>
    %48 = vector.shape_cast %47 : vector<1x64x32xf32> to vector<64x32xf32>
    %cst_27 = arith.constant dense<0.000000e+00> : vector<64x1xf32>
    %49 = tpu.matmul %48, %46, %cst_27 {dimension_numbers = #tpu.dot_dimension_numbers<[1], [0], [0], [1], [0, 0, 1, 1], [], []>} : vector<64x32xf32>, vector<32x1xf32>, vector<64x1xf32> -> vector<64x1xf32>
    %50 = arith.addf %2, %49 : vector<64x1xf32>
    %51 = vector.extract_strided_slice %1 {offsets = [0, 1], sizes = [1, 33], strides = [1, 1]} : vector<1x40xf32> to vector<1x33xf32>
    %c9 = arith.constant 9 : index
    %c0_28 = arith.constant 0 : index
    %c0_29 = arith.constant 0 : index
    %52 = vector.load %arg2[%c9, %c0_28, %c0_29] : memref<27x10x1xf32, #tpu.memory_space<vmem>>, vector<1x10x1xf32>
    %53 = vector.shape_cast %52 : vector<1x10x1xf32> to vector<10x1xf32>
    %54 = vector.broadcast %53 : vector<10x1xf32> to vector<10x33xf32>
    %55 = vector.broadcast %51 : vector<1x33xf32> to vector<10x33xf32>
    %56 = arith.mulf %54, %55 : vector<10x33xf32>
    %57 = vector.extract_strided_slice %1 {offsets = [0, 2], sizes = [1, 33], strides = [1, 1]} : vector<1x40xf32> to vector<1x33xf32>
    %c10 = arith.constant 10 : index
    %c0_30 = arith.constant 0 : index
    %c0_31 = arith.constant 0 : index
    %58 = vector.load %arg2[%c10, %c0_30, %c0_31] : memref<27x10x1xf32, #tpu.memory_space<vmem>>, vector<1x10x1xf32>
    %59 = vector.shape_cast %58 : vector<1x10x1xf32> to vector<10x1xf32>
    %60 = vector.broadcast %59 : vector<10x1xf32> to vector<10x33xf32>
    %61 = vector.broadcast %57 : vector<1x33xf32> to vector<10x33xf32>
    %62 = arith.mulf %60, %61 : vector<10x33xf32>
    %63 = arith.addf %56, %62 : vector<10x33xf32>
    %64 = vector.extract_strided_slice %1 {offsets = [0, 3], sizes = [1, 33], strides = [1, 1]} : vector<1x40xf32> to vector<1x33xf32>
    %c11 = arith.constant 11 : index
    %c0_32 = arith.constant 0 : index
    %c0_33 = arith.constant 0 : index
    %65 = vector.load %arg2[%c11, %c0_32, %c0_33] : memref<27x10x1xf32, #tpu.memory_space<vmem>>, vector<1x10x1xf32>
    %66 = vector.shape_cast %65 : vector<1x10x1xf32> to vector<10x1xf32>
    %67 = vector.broadcast %66 : vector<10x1xf32> to vector<10x33xf32>
    %68 = vector.broadcast %64 : vector<1x33xf32> to vector<10x33xf32>
    %69 = arith.mulf %67, %68 : vector<10x33xf32>
    %70 = arith.addf %63, %69 : vector<10x33xf32>
    %71 = vector.extract_strided_slice %1 {offsets = [0, 4], sizes = [1, 33], strides = [1, 1]} : vector<1x40xf32> to vector<1x33xf32>
    %c12 = arith.constant 12 : index
    %c0_34 = arith.constant 0 : index
    %c0_35 = arith.constant 0 : index
    %72 = vector.load %arg2[%c12, %c0_34, %c0_35] : memref<27x10x1xf32, #tpu.memory_space<vmem>>, vector<1x10x1xf32>
    %73 = vector.shape_cast %72 : vector<1x10x1xf32> to vector<10x1xf32>
    %74 = vector.broadcast %73 : vector<10x1xf32> to vector<10x33xf32>
    %75 = vector.broadcast %71 : vector<1x33xf32> to vector<10x33xf32>
    %76 = arith.mulf %74, %75 : vector<10x33xf32>
    %77 = arith.addf %70, %76 : vector<10x33xf32>
    %78 = vector.extract_strided_slice %1 {offsets = [0, 5], sizes = [1, 33], strides = [1, 1]} : vector<1x40xf32> to vector<1x33xf32>
    %c13 = arith.constant 13 : index
    %c0_36 = arith.constant 0 : index
    %c0_37 = arith.constant 0 : index
    %79 = vector.load %arg2[%c13, %c0_36, %c0_37] : memref<27x10x1xf32, #tpu.memory_space<vmem>>, vector<1x10x1xf32>
    %80 = vector.shape_cast %79 : vector<1x10x1xf32> to vector<10x1xf32>
    %81 = vector.broadcast %80 : vector<10x1xf32> to vector<10x33xf32>
    %82 = vector.broadcast %78 : vector<1x33xf32> to vector<10x33xf32>
    %83 = arith.mulf %81, %82 : vector<10x33xf32>
    %84 = arith.addf %77, %83 : vector<10x33xf32>
    %85 = vector.extract_strided_slice %1 {offsets = [0, 6], sizes = [1, 33], strides = [1, 1]} : vector<1x40xf32> to vector<1x33xf32>
    %c14 = arith.constant 14 : index
    %c0_38 = arith.constant 0 : index
    %c0_39 = arith.constant 0 : index
    %86 = vector.load %arg2[%c14, %c0_38, %c0_39] : memref<27x10x1xf32, #tpu.memory_space<vmem>>, vector<1x10x1xf32>
    %87 = vector.shape_cast %86 : vector<1x10x1xf32> to vector<10x1xf32>
    %88 = vector.broadcast %87 : vector<10x1xf32> to vector<10x33xf32>
    %89 = vector.broadcast %85 : vector<1x33xf32> to vector<10x33xf32>
    %90 = arith.mulf %88, %89 : vector<10x33xf32>
    %91 = arith.addf %84, %90 : vector<10x33xf32>
    %c1_40 = arith.constant 1 : index
    %c0_41 = arith.constant 0 : index
    %c0_42 = arith.constant 0 : index
    %92 = vector.load %arg3[%c1_40, %c0_41, %c0_42] : memref<3x10x1xf32, #tpu.memory_space<vmem>>, vector<1x10x1xf32>
    %93 = vector.shape_cast %92 : vector<1x10x1xf32> to vector<10x1xf32>
    %94 = vector.broadcast %93 : vector<10x1xf32> to vector<10x33xf32>
    %95 = arith.addf %91, %94 : vector<10x33xf32>
    %cst_43 = arith.constant 0.000000e+00 : f32
    %96 = vector.broadcast %cst_43 : f32 to vector<10x33xf32>
    %97 = arith.maximumf %95, %96 : vector<10x33xf32>
    %cst_44 = arith.constant 0.000000e+00 : f32
    %98 = vector.broadcast %cst_44 : f32 to vector<10x3xf32>
    %99 = tpu.concatenate %98, %97, %98 in 1 : vector<10x3xf32>, vector<10x33xf32>, vector<10x3xf32> -> vector<10x39xf32>
    %100 = vector.extract_strided_slice %99 {offsets = [0, 0], sizes = [10, 34], strides = [1, 1]} : vector<10x39xf32> to vector<10x34xf32>
    %101 = vector.extract_strided_slice %99 {offsets = [0, 1], sizes = [10, 34], strides = [1, 1]} : vector<10x39xf32> to vector<10x34xf32>
    %102 = vector.extract_strided_slice %99 {offsets = [0, 2], sizes = [10, 34], strides = [1, 1]} : vector<10x39xf32> to vector<10x34xf32>
    %103 = vector.extract_strided_slice %99 {offsets = [0, 3], sizes = [10, 34], strides = [1, 1]} : vector<10x39xf32> to vector<10x34xf32>
    %104 = vector.extract_strided_slice %99 {offsets = [0, 4], sizes = [10, 34], strides = [1, 1]} : vector<10x39xf32> to vector<10x34xf32>
    %105 = vector.extract_strided_slice %99 {offsets = [0, 5], sizes = [10, 34], strides = [1, 1]} : vector<10x39xf32> to vector<10x34xf32>
    %106 = tpu.concatenate %100, %101, %102, %103, %104, %105 in 0 : vector<10x34xf32>, vector<10x34xf32>, vector<10x34xf32>, vector<10x34xf32>, vector<10x34xf32>, vector<10x34xf32> -> vector<60x34xf32>
    %c1_45 = arith.constant 1 : index
    %c0_46 = arith.constant 0 : index
    %c0_47 = arith.constant 0 : index
    %107 = vector.load %arg4[%c1_45, %c0_46, %c0_47] : memref<3x32x90xf32, #tpu.memory_space<vmem>>, vector<1x32x90xf32>
    %108 = vector.shape_cast %107 : vector<1x32x90xf32> to vector<32x90xf32>
    %109 = vector.extract_strided_slice %108 {offsets = [0, 0], sizes = [32, 60], strides = [1, 1]} : vector<32x90xf32> to vector<32x60xf32>
    %cst_48 = arith.constant dense<0.000000e+00> : vector<32x34xf32>
    %110 = tpu.matmul %109, %106, %cst_48 {dimension_numbers = #tpu.dot_dimension_numbers<[1], [0], [0], [1], [0, 0, 1, 1], [], []>} : vector<32x60xf32>, vector<60x34xf32>, vector<32x34xf32> -> vector<32x34xf32>
    %c1_49 = arith.constant 1 : index
    %c0_50 = arith.constant 0 : index
    %c0_51 = arith.constant 0 : index
    %111 = vector.load %arg5[%c1_49, %c0_50, %c0_51] : memref<3x32x1xf32, #tpu.memory_space<vmem>>, vector<1x32x1xf32>
    %112 = vector.shape_cast %111 : vector<1x32x1xf32> to vector<32x1xf32>
    %113 = vector.broadcast %112 : vector<32x1xf32> to vector<32x34xf32>
    %114 = arith.addf %110, %113 : vector<32x34xf32>
    %cst_52 = arith.constant 0.000000e+00 : f32
    %115 = vector.broadcast %cst_52 : f32 to vector<32x34xf32>
    %116 = arith.maximumf %114, %115 : vector<32x34xf32>
    %117 = vector.extract_strided_slice %116 {offsets = [0, 0], sizes = [32, 32], strides = [1, 1]} : vector<32x34xf32> to vector<32x32xf32>
    %cst_53 = arith.constant dense<0xFF800000> : vector<32xf32>
    %118 = vector.multi_reduction <maximumf>, %117, %cst_53 [1] : vector<32x32xf32> to vector<32xf32>
    %119 = vector.shape_cast %118 : vector<32xf32> to vector<32x1xf32>
    %c1_54 = arith.constant 1 : index
    %c0_55 = arith.constant 0 : index
    %c0_56 = arith.constant 0 : index
    %120 = vector.load %arg6[%c1_54, %c0_55, %c0_56] : memref<3x64x32xf32, #tpu.memory_space<vmem>>, vector<1x64x32xf32>
    %121 = vector.shape_cast %120 : vector<1x64x32xf32> to vector<64x32xf32>
    %cst_57 = arith.constant dense<0.000000e+00> : vector<64x1xf32>
    %122 = tpu.matmul %121, %119, %cst_57 {dimension_numbers = #tpu.dot_dimension_numbers<[1], [0], [0], [1], [0, 0, 1, 1], [], []>} : vector<64x32xf32>, vector<32x1xf32>, vector<64x1xf32> -> vector<64x1xf32>
    %123 = arith.addf %50, %122 : vector<64x1xf32>
    %124 = vector.extract_strided_slice %1 {offsets = [0, 0], sizes = [1, 32], strides = [1, 1]} : vector<1x40xf32> to vector<1x32xf32>
    %c18 = arith.constant 18 : index
    %c0_58 = arith.constant 0 : index
    %c0_59 = arith.constant 0 : index
    %125 = vector.load %arg2[%c18, %c0_58, %c0_59] : memref<27x10x1xf32, #tpu.memory_space<vmem>>, vector<1x10x1xf32>
    %126 = vector.shape_cast %125 : vector<1x10x1xf32> to vector<10x1xf32>
    %127 = vector.broadcast %126 : vector<10x1xf32> to vector<10x32xf32>
    %128 = vector.broadcast %124 : vector<1x32xf32> to vector<10x32xf32>
    %129 = arith.mulf %127, %128 : vector<10x32xf32>
    %130 = vector.extract_strided_slice %1 {offsets = [0, 1], sizes = [1, 32], strides = [1, 1]} : vector<1x40xf32> to vector<1x32xf32>
    %c19 = arith.constant 19 : index
    %c0_60 = arith.constant 0 : index
    %c0_61 = arith.constant 0 : index
    %131 = vector.load %arg2[%c19, %c0_60, %c0_61] : memref<27x10x1xf32, #tpu.memory_space<vmem>>, vector<1x10x1xf32>
    %132 = vector.shape_cast %131 : vector<1x10x1xf32> to vector<10x1xf32>
    %133 = vector.broadcast %132 : vector<10x1xf32> to vector<10x32xf32>
    %134 = vector.broadcast %130 : vector<1x32xf32> to vector<10x32xf32>
    %135 = arith.mulf %133, %134 : vector<10x32xf32>
    %136 = arith.addf %129, %135 : vector<10x32xf32>
    %137 = vector.extract_strided_slice %1 {offsets = [0, 2], sizes = [1, 32], strides = [1, 1]} : vector<1x40xf32> to vector<1x32xf32>
    %c20 = arith.constant 20 : index
    %c0_62 = arith.constant 0 : index
    %c0_63 = arith.constant 0 : index
    %138 = vector.load %arg2[%c20, %c0_62, %c0_63] : memref<27x10x1xf32, #tpu.memory_space<vmem>>, vector<1x10x1xf32>
    %139 = vector.shape_cast %138 : vector<1x10x1xf32> to vector<10x1xf32>
    %140 = vector.broadcast %139 : vector<10x1xf32> to vector<10x32xf32>
    %141 = vector.broadcast %137 : vector<1x32xf32> to vector<10x32xf32>
    %142 = arith.mulf %140, %141 : vector<10x32xf32>
    %143 = arith.addf %136, %142 : vector<10x32xf32>
    %144 = vector.extract_strided_slice %1 {offsets = [0, 3], sizes = [1, 32], strides = [1, 1]} : vector<1x40xf32> to vector<1x32xf32>
    %c21 = arith.constant 21 : index
    %c0_64 = arith.constant 0 : index
    %c0_65 = arith.constant 0 : index
    %145 = vector.load %arg2[%c21, %c0_64, %c0_65] : memref<27x10x1xf32, #tpu.memory_space<vmem>>, vector<1x10x1xf32>
    %146 = vector.shape_cast %145 : vector<1x10x1xf32> to vector<10x1xf32>
    %147 = vector.broadcast %146 : vector<10x1xf32> to vector<10x32xf32>
    %148 = vector.broadcast %144 : vector<1x32xf32> to vector<10x32xf32>
    %149 = arith.mulf %147, %148 : vector<10x32xf32>
    %150 = arith.addf %143, %149 : vector<10x32xf32>
    %151 = vector.extract_strided_slice %1 {offsets = [0, 4], sizes = [1, 32], strides = [1, 1]} : vector<1x40xf32> to vector<1x32xf32>
    %c22 = arith.constant 22 : index
    %c0_66 = arith.constant 0 : index
    %c0_67 = arith.constant 0 : index
    %152 = vector.load %arg2[%c22, %c0_66, %c0_67] : memref<27x10x1xf32, #tpu.memory_space<vmem>>, vector<1x10x1xf32>
    %153 = vector.shape_cast %152 : vector<1x10x1xf32> to vector<10x1xf32>
    %154 = vector.broadcast %153 : vector<10x1xf32> to vector<10x32xf32>
    %155 = vector.broadcast %151 : vector<1x32xf32> to vector<10x32xf32>
    %156 = arith.mulf %154, %155 : vector<10x32xf32>
    %157 = arith.addf %150, %156 : vector<10x32xf32>
    %158 = vector.extract_strided_slice %1 {offsets = [0, 5], sizes = [1, 32], strides = [1, 1]} : vector<1x40xf32> to vector<1x32xf32>
    %c23 = arith.constant 23 : index
    %c0_68 = arith.constant 0 : index
    %c0_69 = arith.constant 0 : index
    %159 = vector.load %arg2[%c23, %c0_68, %c0_69] : memref<27x10x1xf32, #tpu.memory_space<vmem>>, vector<1x10x1xf32>
    %160 = vector.shape_cast %159 : vector<1x10x1xf32> to vector<10x1xf32>
    %161 = vector.broadcast %160 : vector<10x1xf32> to vector<10x32xf32>
    %162 = vector.broadcast %158 : vector<1x32xf32> to vector<10x32xf32>
    %163 = arith.mulf %161, %162 : vector<10x32xf32>
    %164 = arith.addf %157, %163 : vector<10x32xf32>
    %165 = vector.extract_strided_slice %1 {offsets = [0, 6], sizes = [1, 32], strides = [1, 1]} : vector<1x40xf32> to vector<1x32xf32>
    %c24 = arith.constant 24 : index
    %c0_70 = arith.constant 0 : index
    %c0_71 = arith.constant 0 : index
    %166 = vector.load %arg2[%c24, %c0_70, %c0_71] : memref<27x10x1xf32, #tpu.memory_space<vmem>>, vector<1x10x1xf32>
    %167 = vector.shape_cast %166 : vector<1x10x1xf32> to vector<10x1xf32>
    %168 = vector.broadcast %167 : vector<10x1xf32> to vector<10x32xf32>
    %169 = vector.broadcast %165 : vector<1x32xf32> to vector<10x32xf32>
    %170 = arith.mulf %168, %169 : vector<10x32xf32>
    %171 = arith.addf %164, %170 : vector<10x32xf32>
    %172 = vector.extract_strided_slice %1 {offsets = [0, 7], sizes = [1, 32], strides = [1, 1]} : vector<1x40xf32> to vector<1x32xf32>
    %c25 = arith.constant 25 : index
    %c0_72 = arith.constant 0 : index
    %c0_73 = arith.constant 0 : index
    %173 = vector.load %arg2[%c25, %c0_72, %c0_73] : memref<27x10x1xf32, #tpu.memory_space<vmem>>, vector<1x10x1xf32>
    %174 = vector.shape_cast %173 : vector<1x10x1xf32> to vector<10x1xf32>
    %175 = vector.broadcast %174 : vector<10x1xf32> to vector<10x32xf32>
    %176 = vector.broadcast %172 : vector<1x32xf32> to vector<10x32xf32>
    %177 = arith.mulf %175, %176 : vector<10x32xf32>
    %178 = arith.addf %171, %177 : vector<10x32xf32>
    %179 = vector.extract_strided_slice %1 {offsets = [0, 8], sizes = [1, 32], strides = [1, 1]} : vector<1x40xf32> to vector<1x32xf32>
    %c26 = arith.constant 26 : index
    %c0_74 = arith.constant 0 : index
    %c0_75 = arith.constant 0 : index
    %180 = vector.load %arg2[%c26, %c0_74, %c0_75] : memref<27x10x1xf32, #tpu.memory_space<vmem>>, vector<1x10x1xf32>
    %181 = vector.shape_cast %180 : vector<1x10x1xf32> to vector<10x1xf32>
    %182 = vector.broadcast %181 : vector<10x1xf32> to vector<10x32xf32>
    %183 = vector.broadcast %179 : vector<1x32xf32> to vector<10x32xf32>
    %184 = arith.mulf %182, %183 : vector<10x32xf32>
    %185 = arith.addf %178, %184 : vector<10x32xf32>
    %c2_76 = arith.constant 2 : index
    %c0_77 = arith.constant 0 : index
    %c0_78 = arith.constant 0 : index
    %186 = vector.load %arg3[%c2_76, %c0_77, %c0_78] : memref<3x10x1xf32, #tpu.memory_space<vmem>>, vector<1x10x1xf32>
    %187 = vector.shape_cast %186 : vector<1x10x1xf32> to vector<10x1xf32>
    %188 = vector.broadcast %187 : vector<10x1xf32> to vector<10x32xf32>
    %189 = arith.addf %185, %188 : vector<10x32xf32>
    %cst_79 = arith.constant 0.000000e+00 : f32
    %190 = vector.broadcast %cst_79 : f32 to vector<10x32xf32>
    %191 = arith.maximumf %189, %190 : vector<10x32xf32>
    %cst_80 = arith.constant 0.000000e+00 : f32
    %192 = vector.broadcast %cst_80 : f32 to vector<10x4xf32>
    %193 = tpu.concatenate %192, %191, %192 in 1 : vector<10x4xf32>, vector<10x32xf32>, vector<10x4xf32> -> vector<10x40xf32>
    %194 = vector.extract_strided_slice %193 {offsets = [0, 0], sizes = [10, 32], strides = [1, 1]} : vector<10x40xf32> to vector<10x32xf32>
    %195 = vector.extract_strided_slice %193 {offsets = [0, 1], sizes = [10, 32], strides = [1, 1]} : vector<10x40xf32> to vector<10x32xf32>
    %196 = vector.extract_strided_slice %193 {offsets = [0, 2], sizes = [10, 32], strides = [1, 1]} : vector<10x40xf32> to vector<10x32xf32>
    %197 = vector.extract_strided_slice %193 {offsets = [0, 3], sizes = [10, 32], strides = [1, 1]} : vector<10x40xf32> to vector<10x32xf32>
    %198 = vector.extract_strided_slice %193 {offsets = [0, 4], sizes = [10, 32], strides = [1, 1]} : vector<10x40xf32> to vector<10x32xf32>
    %199 = vector.extract_strided_slice %193 {offsets = [0, 5], sizes = [10, 32], strides = [1, 1]} : vector<10x40xf32> to vector<10x32xf32>
    %200 = vector.extract_strided_slice %193 {offsets = [0, 6], sizes = [10, 32], strides = [1, 1]} : vector<10x40xf32> to vector<10x32xf32>
    %201 = vector.extract_strided_slice %193 {offsets = [0, 7], sizes = [10, 32], strides = [1, 1]} : vector<10x40xf32> to vector<10x32xf32>
    %202 = vector.extract_strided_slice %193 {offsets = [0, 8], sizes = [10, 32], strides = [1, 1]} : vector<10x40xf32> to vector<10x32xf32>
    %203 = tpu.concatenate %194, %195, %196, %197, %198, %199, %200, %201, %202 in 0 : vector<10x32xf32>, vector<10x32xf32>, vector<10x32xf32>, vector<10x32xf32>, vector<10x32xf32>, vector<10x32xf32>, vector<10x32xf32>, vector<10x32xf32>, vector<10x32xf32> -> vector<90x32xf32>
    %c2_81 = arith.constant 2 : index
    %c0_82 = arith.constant 0 : index
    %c0_83 = arith.constant 0 : index
    %204 = vector.load %arg4[%c2_81, %c0_82, %c0_83] : memref<3x32x90xf32, #tpu.memory_space<vmem>>, vector<1x32x90xf32>
    %205 = vector.shape_cast %204 : vector<1x32x90xf32> to vector<32x90xf32>
    %cst_84 = arith.constant dense<0.000000e+00> : vector<32x32xf32>
    %206 = tpu.matmul %205, %203, %cst_84 {dimension_numbers = #tpu.dot_dimension_numbers<[1], [0], [0], [1], [0, 0, 1, 1], [], []>} : vector<32x90xf32>, vector<90x32xf32>, vector<32x32xf32> -> vector<32x32xf32>
    %c2_85 = arith.constant 2 : index
    %c0_86 = arith.constant 0 : index
    %c0_87 = arith.constant 0 : index
    %207 = vector.load %arg5[%c2_85, %c0_86, %c0_87] : memref<3x32x1xf32, #tpu.memory_space<vmem>>, vector<1x32x1xf32>
    %208 = vector.shape_cast %207 : vector<1x32x1xf32> to vector<32x1xf32>
    %209 = vector.broadcast %208 : vector<32x1xf32> to vector<32x32xf32>
    %210 = arith.addf %206, %209 : vector<32x32xf32>
    %cst_88 = arith.constant 0.000000e+00 : f32
    %211 = vector.broadcast %cst_88 : f32 to vector<32x32xf32>
    %212 = arith.maximumf %210, %211 : vector<32x32xf32>
    %cst_89 = arith.constant dense<0xFF800000> : vector<32xf32>
    %213 = vector.multi_reduction <maximumf>, %212, %cst_89 [1] : vector<32x32xf32> to vector<32xf32>
    %214 = vector.shape_cast %213 : vector<32xf32> to vector<32x1xf32>
    %c2_90 = arith.constant 2 : index
    %c0_91 = arith.constant 0 : index
    %c0_92 = arith.constant 0 : index
    %215 = vector.load %arg6[%c2_90, %c0_91, %c0_92] : memref<3x64x32xf32, #tpu.memory_space<vmem>>, vector<1x64x32xf32>
    %216 = vector.shape_cast %215 : vector<1x64x32xf32> to vector<64x32xf32>
    %cst_93 = arith.constant dense<0.000000e+00> : vector<64x1xf32>
    %217 = tpu.matmul %216, %214, %cst_93 {dimension_numbers = #tpu.dot_dimension_numbers<[1], [0], [0], [1], [0, 0, 1, 1], [], []>} : vector<64x32xf32>, vector<32x1xf32>, vector<64x1xf32> -> vector<64x1xf32>
    %218 = arith.addf %123, %217 : vector<64x1xf32>
    %cst_94 = arith.constant 0.000000e+00 : f32
    %219 = vector.broadcast %cst_94 : f32 to vector<64x1xf32>
    %220 = arith.maximumf %218, %219 : vector<64x1xf32>
    %c0_95 = arith.constant 0 : index
    %c0_96 = arith.constant 0 : index
    %221 = vector.load %arg8[%c0_95, %c0_96] : memref<2x64xf32, #tpu.memory_space<vmem>>, vector<2x64xf32>
    %cst_97 = arith.constant dense<0.000000e+00> : vector<2x1xf32>
    %222 = tpu.matmul %221, %220, %cst_97 {dimension_numbers = #tpu.dot_dimension_numbers<[1], [0], [0], [1], [0, 0, 1, 1], [], []>} : vector<2x64xf32>, vector<64x1xf32>, vector<2x1xf32> -> vector<2x1xf32>
    %c0_98 = arith.constant 0 : index
    %c0_99 = arith.constant 0 : index
    %223 = vector.load %arg9[%c0_98, %c0_99] : memref<2x1xf32, #tpu.memory_space<vmem>>, vector<2x1xf32>
    %224 = arith.addf %222, %223 : vector<2x1xf32>
    %c0_100 = arith.constant 0 : index
    %c0_101 = arith.constant 0 : index
    %c0_102 = arith.constant 0 : index
    %225 = vector.load %arg10[%c0_100, %c0_101, %c0_102] : memref<1x2x1xf32, #tpu.memory_space<vmem>>, vector<1x2x1xf32>
    %226 = vector.shape_cast %225 : vector<1x2x1xf32> to vector<2x1xf32>
    %227 = vector.shape_cast %224 : vector<2x1xf32> to vector<1x2x1xf32>
    tpu.vector_store %arg10[%c0_100, %c0_101, %c0_102], %227 {strides = array<i32>} : memref<1x2x1xf32, #tpu.memory_space<vmem>>, vector<1x2x1xf32>,
    return
  }
  func.func @transform_0(%arg0: i32) -> (i32, i32, i32) {
    %c0_i32 = arith.constant 0 : i32
    %c0_i32_0 = arith.constant 0 : i32
    %c0_i32_1 = arith.constant 0 : i32
    return %arg0, %c0_i32, %c0_i32_0 : i32, i32, i32
  }
  func.func @transform_1(%arg0: i32) -> (i32, i32, i32) {
    %c0_i32 = arith.constant 0 : i32
    %c0_i32_0 = arith.constant 0 : i32
    %c0_i32_1 = arith.constant 0 : i32
    %c0_i32_2 = arith.constant 0 : i32
    return %c0_i32, %c0_i32_0, %c0_i32_1 : i32, i32, i32
  }
  func.func @transform_2(%arg0: i32) -> (i32, i32, i32) {
    %c0_i32 = arith.constant 0 : i32
    %c0_i32_0 = arith.constant 0 : i32
    %c0_i32_1 = arith.constant 0 : i32
    %c0_i32_2 = arith.constant 0 : i32
    return %c0_i32, %c0_i32_0, %c0_i32_1 : i32, i32, i32
  }
  func.func @transform_3(%arg0: i32) -> (i32, i32, i32) {
    %c0_i32 = arith.constant 0 : i32
    %c0_i32_0 = arith.constant 0 : i32
    %c0_i32_1 = arith.constant 0 : i32
    %c0_i32_2 = arith.constant 0 : i32
    return %c0_i32, %c0_i32_0, %c0_i32_1 : i32, i32, i32
  }
  func.func @transform_4(%arg0: i32) -> (i32, i32, i32) {
    %c0_i32 = arith.constant 0 : i32
    %c0_i32_0 = arith.constant 0 : i32
    %c0_i32_1 = arith.constant 0 : i32
    %c0_i32_2 = arith.constant 0 : i32
    return %c0_i32, %c0_i32_0, %c0_i32_1 : i32, i32, i32
  }
  func.func @transform_5(%arg0: i32) -> (i32, i32, i32) {
    %c0_i32 = arith.constant 0 : i32
    %c0_i32_0 = arith.constant 0 : i32
    %c0_i32_1 = arith.constant 0 : i32
    %c0_i32_2 = arith.constant 0 : i32
    return %c0_i32, %c0_i32_0, %c0_i32_1 : i32, i32, i32
  }
  func.func @transform_6(%arg0: i32) -> (i32, i32) {
    %c0_i32 = arith.constant 0 : i32
    %c0_i32_0 = arith.constant 0 : i32
    %c0_i32_1 = arith.constant 0 : i32
    return %c0_i32, %c0_i32_0 : i32, i32
  }
  func.func @transform_7(%arg0: i32) -> (i32, i32) {
    %c0_i32 = arith.constant 0 : i32
    %c0_i32_0 = arith.constant 0 : i32
    %c0_i32_1 = arith.constant 0 : i32
    return %c0_i32, %c0_i32_0 : i32, i32
  }
  func.func @transform_8(%arg0: i32) -> (i32, i32) {
    %c0_i32 = arith.constant 0 : i32
    %c0_i32_0 = arith.constant 0 : i32
    %c0_i32_1 = arith.constant 0 : i32
    return %c0_i32, %c0_i32_0 : i32, i32
  }
  func.func @transform_9(%arg0: i32) -> (i32, i32, i32) {
    %c0_i32 = arith.constant 0 : i32
    %c0_i32_0 = arith.constant 0 : i32
    %c0_i32_1 = arith.constant 0 : i32
    return %arg0, %c0_i32, %c0_i32_0 : i32, i32, i32
  }
}

</mosaic_0001>

<bundles_post_ra>
// kernel: tpu_custom_call.1
= control target key start
LH: loop header
LB: loop body
LE: loop exit
PB: predicated region body
PF: predicated region fallthrough
CT: control target
= control target key end

     0   :  { %s2633_s30 = smov 0   ;;  %s3176_s0 = inlined_call_operand.vmem [shape: f32[4,1,40], index: 0, kind: input, shape index: {}]   ;;  %s3177_s1 = inlined_call_operand.vmem [shape: f32[27,10,1], index: 1, kind: input, shape index: {}]   ;;  %s3178_s2 = inlined_call_operand.vmem [shape: f32[3,10,1], index: 2, kind: input, shape index: {}]   ;;  %s3179_s3 = inlined_call_operand.vmem [shape: f32[3,32,90], index: 3, kind: input, shape index: {}]   ;;  %s3180_s4 = inlined_call_operand.vmem [shape: f32[3,32,1], index: 4, kind: input, shape index: {}]   ;;  %s3181_s5 = inlined_call_operand.vmem [shape: f32[3,64,32], index: 5, kind: input, shape index: {}]   ;;  %s3182_s6 = inlined_call_operand.vmem [shape: f32[64,1], index: 6, kind: input, shape index: {}]   ;;  %s3183_s7 = inlined_call_operand.vmem [shape: f32[2,64], index: 7, kind: input, shape index: {}]   ;;  %s3184_s8 = inlined_call_operand.vmem [shape: f32[2,1], index: 8, kind: input, shape index: {}]   ;;  %s3185_s9 = inlined_call_operand.vmem [shape: f32[4,2,1], index: 9, kind: output, shape index: {}]  }
   0x1 LB: > { %s1992_s10 = sadd.s32 4294967295, %s2566_s30   ;;  %p1996_p0 = scmp.ge.s32.totalorder %s2566_s30, 1  ;;  %s2566_s30 = sphi %s2633_s30, %s19_s30  }
   0x2   : > { %p285_p1 = scmp.lt.s32.totalorder %s2566_s30, 5 }
   0x4   : > { %p286_p2 = pnand %p1996_p0, %p285_p1 }
   0x5   : > { %v2019_v0 = vld [vmem:[%s3177_s1 + $0xa0] sm:$0xff] (!%p286_p2)  ;;  %v1999_v1 = vld [vmem:[%s3177_s1 + $0x10] sm:$0xff] (!%p286_p2)  ;;  %v2568_v2 = vmov (!%p286_p2), 0   ;;  %v2000_v3 = vld [vmem:[%s3177_s1 + $0x18] sm:$0x3] (!%p286_p2)  ;;  %p318_p3 = scmp.lt.s32.totalorder (!%p286_p2), %s1992_s10, 3 }
   0x6   : > { %289 = sbr.rel (%p286_p2) target bundleno = 1405 (0x57d), region = 56  ;;  %2484 = vset.pattern.permute.xlu1 (!%p286_p2), %v2568_v2  ;;  %2483 = vset.pattern.permute.xlu0 (!%p286_p2), %v2568_v2  ;;  %v2001_v4 = vld [vmem:[%s3177_s1 + $0x20] sm:$0xff] (!%p286_p2)  ;;  %v2002_v5 = vld [vmem:[%s3177_s1 + $0x28] sm:$0x3] (!%p286_p2)  ;;  %v2021_v6 = vld [vmem:[%s3177_s1 + $0xb0] sm:$0xff] (!%p286_p2)  ;;  %s2569_s22 = smov (!%p286_p2), 127  }
   0x7   : > { %768 = vperm.xlu1 (!%p286_p2), %2484, %v2019_v0   ;;  %359 = vperm.xlu0 (!%p286_p2), %2483, %v1999_v1   ;;  %v2023_v7 = vld [vmem:[%s3177_s1 + $0xc0] sm:$0xff] (!%p286_p2)  ;;  %v2020_v8 = vld [vmem:[%s3177_s1 + $0xa8] sm:$0x3] (!%p286_p2)  ;;  %v2025_v9 = vld [vmem:[%s3177_s1 + $0xd0] sm:$0xff] (!%p286_p2)  ;;  %s2570_s23 = smov (!%p286_p2), 126   ;;  %s2571_s24 = smov (!%p286_p2), 124  }
   0x8   : > { %v2022_v10 = vld [vmem:[%s3177_s1 + $0xb8] sm:$0x3] (!%p286_p2)  ;;  %v2027_v11 = vld [vmem:[%s3177_s1 + $0xe0] sm:$0xff] (!%p286_p2)  ;;  %v2024_v12 = vld [vmem:[%s3177_s1 + $0xc8] sm:$0x3] (!%p286_p2)  ;;  %s2572_s25 = smov (!%p286_p2), 125  }
   0x9   : > { %v2063_v13 = vld [vmem:[%s3177_s1 + $0x130] sm:$0xff] (!%p286_p2)  ;;  %v2026_v14 = vld [vmem:[%s3177_s1 + $0xd8] sm:$0x3] (!%p286_p2)  ;;  %v2065_v15 = vld [vmem:[%s3177_s1 + $0x140] sm:$0xff] (!%p286_p2)  ;;  %s2573_s26 = smov (!%p286_p2), 123   ;;  %s2574_s27 = smov (!%p286_p2), 122  }
   0xa   : > { %v2028_v16 = vld [vmem:[%s3177_s1 + $0xe8] sm:$0x3] (!%p286_p2)  ;;  %v2067_v17 = vld [vmem:[%s3177_s1 + $0x150] sm:$0xff] (!%p286_p2)  ;;  %v2064_v18 = vld [vmem:[%s3177_s1 + $0x138] sm:$0x3] (!%p286_p2)  ;;  %s2575_s28 = smov (!%p286_p2), 121  }
   0xb   : > { %364 = vperm.xlu1 (!%p286_p2), %2484, %v2000_v3   ;;  %384 = vperm.xlu0 (!%p286_p2), %2483, %v2001_v4   ;;  %v2069_v19 = vld [vmem:[%s3177_s1 + $0x160] sm:$0xff] (!%p286_p2)  ;;  %v2066_v20 = vld [vmem:[%s3177_s1 + $0x148] sm:$0x3] (!%p286_p2)  ;;  %v2071_v21 = vld [vmem:[%s3177_s1 + $0x170] sm:$0xff] (!%p286_p2)  ;;  %s2576_s29 = smov (!%p286_p2), 120   ;;  %s2577_s11 = smov (!%p286_p2), 2  }
   0xc   : > { %v2068_v22 = vld [vmem:[%s3177_s1 + $0x158] sm:$0x3] (!%p286_p2)  ;;  %v2073_v23 = vld [vmem:[%s3177_s1 + $0x180] sm:$0xff] (!%p286_p2)  ;;  %v2070_v24 = vld [vmem:[%s3177_s1 + $0x168] sm:$0x3] (!%p286_p2)  ;;  %s2578_s12 = smov (!%p286_p2), 4  }
   0xd   : > { %v2075_v25 = vld [vmem:[%s3177_s1 + $0x190] sm:$0xff]  ;;  %v2072_v26 = vld [vmem:[%s3177_s1 + $0x178] sm:$0x3]  ;;  %v2077_v27 = vld [vmem:[%s3177_s1 + $0x1a0] sm:$0xff]  ;;  %s3189_s10 = smov (!%p318_p3, %s1992_s10), 3  ;;  %vm428_vm0 = vcmask 7168  }
   0xe   : > { %v2074_v28 = vld [vmem:[%s3177_s1 + $0x188] sm:$0x3]  ;;  %v2076_v30 = vld [vmem:[%s3177_s1 + $0x198] sm:$0x3]  ;;  %v2017_v31 = vld [vmem:[%s3177_s1 + $0x90] sm:$0xff]  ;;  %s320_s21 = scalar_lea.vmem %s3176_s0, %s3189_s10  ;;  %vm431_vm1 = vcmask 269312  }
   0xf   : > { %389 = vperm.xlu1 %2484, %v2002_v5   ;;  %793 = vperm.xlu0 %2483, %v2021_v6   ;;  %v2078_v29 = vld [vmem:[%s3177_s1 + $0x1a8] sm:$0x3]  ;;  %v334_v32 = vld [vmem:[%s3177_s1] sm:$0xff]  ;;  %v2018_v33 = vld [vmem:[%s3177_s1 + $0x98] sm:$0x3]  ;;  %vm446_vm2 = vcmask 1043456  }
  0x10   : > { %v335_v34 = vld [vmem:[%s3177_s1 + $0x8] sm:$0x3]  ;;  %v2030_v35 = vld [vmem:[%s3178_s2 + $0x18] sm:$0x3]  ;;  %v404_v36 = vld [vmem:[%s3178_s2] sm:$0xff]  ;;  %vm436_vm3 = vcmask 1041408  }
  0x11   : > { %v2079_v37 = vld [vmem:[%s3178_s2 + $0x20] sm:$0xff]  ;;  %v405_v38 = vld [vmem:[%s3178_s2 + $0x8] sm:$0x3]  ;;  %v2029_v41 = vld [vmem:[%s3178_s2 + $0x10] sm:$0xff]  ;;  %vm485_vm4 = vcmask 244736   ;;  %vm913_vm5 = vcmask 23552  }
  0x12   : > { %v2080_v39 = vld [vmem:[%s3178_s2 + $0x28] sm:$0x3]  ;;  %v2061_v40 = vld [vmem:[%s3177_s1 + $0x120] sm:$0xff]  ;;  %vm916_vm6 = vcmask 293888   ;;  %vm498_vm7 = vcmask 1045504   ;;  %vm1495_vm8 = vcmask 31744  }
  0x13   : > { %818 = vperm.xlu1 %2484, %v2023_v7   ;;  %773 = vperm.xlu0 %2483, %v2020_v8   ;;  %v2062_v42 = vld [vmem:[%s3177_s1 + $0x128] sm:$0x3]  ;;  %v2777_v43 = vld [vmem:[%s320_s21] ss:$0 sm:$0xff]  ;;  %vm2579_vm9 = vmmov 1   ;;  %vm993_vm12 = vcmask 490496  }
  0x14   : > { %vm2341_vm10 = vmpackc.low %vm2579_vm9, %vm431_vm1  ;;  %vm1594_vm15 = vcmask 736256   ;;  %s1997_s13 = sshll.u32 %s3189_s10, 1 }
  0x15   : > { %vm2347_vm11 = vmpackc.low %vm498_vm7, %vm2579_vm9  ;;  %s324_s18 = scalar_lea.vmem %s3185_s9, %s1997_s13 }
  0x16   : > { %vm2975_vm13 = vmpackc.low %vm2579_vm9, %vm916_vm6 }
  0x17   : > { %843 = vperm.xlu1 %2484, %v2025_v9   ;;  %798 = vperm.xlu0 %2483, %v2022_v10   ;;  %vm2375_vm14 = vmpackc.low %vm446_vm2, %vm2579_vm9 }
  0x1b   : > { %868 = vperm.xlu1 %2484, %v2027_v11   ;;  %823 = vperm.xlu0 %2483, %v2024_v12  }
  0x1f   : > { %1275 = vperm.xlu1 %2484, %v2063_v13   ;;  %848 = vperm.xlu0 %2483, %v2026_v14  }
  0x23   : > { %1300 = vperm.xlu1 %2484, %v2065_v15   ;;  %873 = vperm.xlu0 %2483, %v2028_v16  }
  0x27   : > { %1325 = vperm.xlu1 %2484, %v2067_v17   ;;  %1280 = vperm.xlu0 %2483, %v2064_v18  }
  0x2b   : > { %1350 = vperm.xlu1 %2484, %v2069_v19   ;;  %1305 = vperm.xlu0 %2483, %v2066_v20  }
  0x2f   : > { %1375 = vperm.xlu1 %2484, %v2071_v21   ;;  %1330 = vperm.xlu0 %2483, %v2068_v22  }
  0x33   : > { %1400 = vperm.xlu1 %2484, %v2073_v23   ;;  %1355 = vperm.xlu0 %2483, %v2070_v24  }
  0x37   : > { %1425 = vperm.xlu1 %2484, %v2075_v25   ;;  %1380 = vperm.xlu0 %2483, %v2072_v26  }
  0x3b   : > { %1450 = vperm.xlu1 %2484, %v2077_v27   ;;  %1405 = vperm.xlu0 %2483, %v2074_v28  }
  0x3f   : > { %1455 = vperm.xlu1 %2484, %v2078_v29   ;;  %1430 = vperm.xlu0 %2483, %v2076_v30  }
  0x43   : > { %753 = vperm.xlu1 %2484, %v2017_v31   ;;  %338 = vperm.xlu0 %2483, %v334_v32  }
  0x47   : > { %758 = vperm.xlu1 %2484, %v2018_v33   ;;  %343 = vperm.xlu0 %2483, %v335_v34  }
  0x4b   : > { %898 = vperm.xlu1 %2484, %v2030_v35   ;;  %408 = vperm.xlu0 %2483, %v404_v36  }
  0x4f   : > { %1475 = vperm.xlu1 %2484, %v2079_v37   ;;  %413 = vperm.xlu0 %2483, %v405_v38  }
  0x53   : > { %1480 = vperm.xlu1 %2484, %v2080_v39   ;;  %1260 = vperm.xlu0 %2483, %v2061_v40  }
  0x57   : > { %893 = vperm.xlu0 %2483, %v2029_v41  }
  0x5b   : > { %1265 = vperm.xlu0 %2483, %v2062_v42  }
  0x86   : > { %v769_v44 = vpop.permute.xlu1 %768  ;;  %v360_v45 = vpop.permute.xlu0 %359 }
  0x87   : > { %v776_v46 = vmul.f32 %v2777_v43, %v769_v44  ;;  %v367_v47 = vmul.f32 %v2777_v43, %v360_v45 }
  0x89   : > { %780 = vrot.lane.b32.xlu0 %v776_v46, %s2569_s22  ;;  %371 = vrot.lane.b32.xlu1 %v367_v47, %s2569_s22 }
  0x8a   : > { %v365_v48 = vpop.permute.xlu1 %364  ;;  %v385_v49 = vpop.permute.xlu0 %384 }
  0x8b   : > { %v392_v50 = vmul.f32 %v2777_v43, %v385_v49  ;;  %v368_v53 = vmul.f32 %v2777_v43, %v365_v48 }
  0x8d   : > { %396 = vrot.lane.b32.xlu1 %v392_v50, %s2570_s23 }
  0x8e   : > { %v390_v51 = vpop.permute.xlu1 %389  ;;  %v794_v52 = vpop.permute.xlu0 %793 }
  0x8f   : > { %v393_v54 = vmul.f32 %v2777_v43, %v390_v51  ;;  %v801_v57 = vmul.f32 %v2777_v43, %v794_v52 }
  0x91   : > { %398 = vrot.lane.b32.xlu0 %v393_v54, %s2570_s23  ;;  %373 = vrot.lane.b32.xlu1 %v368_v53, %s2569_s22 }
  0x92   : > { %v819_v55 = vpop.permute.xlu1 %818  ;;  %v774_v56 = vpop.permute.xlu0 %773 }
  0x93   : > { %v777_v60 = vmul.f32 %v2777_v43, %v774_v56  ;;  %v826_v0 = vmul.f32 %v2777_v43, %v819_v55 }
  0x95   : > { %805 = vrot.lane.b32.xlu1 %v801_v57, %s2570_s23 }
  0x96   : > { %v844_v58 = vpop.permute.xlu1 %843  ;;  %v799_v59 = vpop.permute.xlu0 %798 }
  0x97   : > { %v851_v61 = vmul.f32 %v2777_v43, %v844_v58  ;;  %v802_v4 = vmul.f32 %v2777_v43, %v799_v59 }
  0x99   : > { %855 = vrot.lane.b32.xlu0 %v851_v61, %s2571_s24  ;;  %782 = vrot.lane.b32.xlu1 %v777_v60, %s2569_s22 }
  0x9a   : > { %v869_v62 = vpop.permute.xlu1 %868  ;;  %v824_v63 = vpop.permute.xlu0 %823 }
  0x9b   : > { %v827_v1 = vmul.f32 %v2777_v43, %v824_v63  ;;  %v876_v8 = vmul.f32 %v2777_v43, %v869_v62 }
  0x9d   : > { %832 = vrot.lane.b32.xlu0 %v827_v1, %s2572_s25  ;;  %830 = vrot.lane.b32.xlu1 %v826_v0, %s2572_s25 }
  0x9e   : > { %v1276_v2 = vpop.permute.xlu1 %1275  ;;  %v849_v3 = vpop.permute.xlu0 %848 }
  0x9f   : > { %v852_v5 = vmul.f32 %v2777_v43, %v849_v3  ;;  %v1283_v12 = vmul.f32 %v2777_v43, %v1276_v2 }
  0xa1   : > { %857 = vrot.lane.b32.xlu0 %v852_v5, %s2571_s24  ;;  %807 = vrot.lane.b32.xlu1 %v802_v4, %s2570_s23 }
  0xa2   : > { %v1301_v6 = vpop.permute.xlu1 %1300  ;;  %v874_v7 = vpop.permute.xlu0 %873 }
  0xa3   : > { %v877_v9 = vmul.f32 %v2777_v43, %v874_v7  ;;  %v1308_v16 = vmul.f32 %v2777_v43, %v1301_v6 }
  0xa5   : > { %882 = vrot.lane.b32.xlu0 %v877_v9, %s2573_s26  ;;  %880 = vrot.lane.b32.xlu1 %v876_v8, %s2573_s26 }
  0xa6   : > { %v1326_v10 = vpop.permute.xlu1 %1325  ;;  %v1281_v11 = vpop.permute.xlu0 %1280 }
  0xa7   : > { %v1284_v13 = vmul.f32 %v2777_v43, %v1281_v11  ;;  %v1333_v20 = vmul.f32 %v2777_v43, %v1326_v10 }
  0xa9   : > { %1289 = vrot.lane.b32.xlu0 %v1284_v13, %s2569_s22  ;;  %1287 = vrot.lane.b32.xlu1 %v1283_v12, %s2569_s22 }
  0xaa   : > { %v1351_v14 = vpop.permute.xlu1 %1350  ;;  %v1306_v15 = vpop.permute.xlu0 %1305 }
  0xab   : > { %v1309_v17 = vmul.f32 %v2777_v43, %v1306_v15  ;;  %v1358_v24 = vmul.f32 %v2777_v43, %v1351_v14 }
  0xad   : > { %1314 = vrot.lane.b32.xlu0 %v1309_v17, %s2570_s23  ;;  %1312 = vrot.lane.b32.xlu1 %v1308_v16, %s2570_s23 }
  0xae   : > { %v1376_v18 = vpop.permute.xlu1 %1375  ;;  %v1331_v19 = vpop.permute.xlu0 %1330 }
  0xaf   : > { %v1334_v21 = vmul.f32 %v2777_v43, %v1331_v19  ;;  %v1383_v28 = vmul.f32 %v2777_v43, %v1376_v18 }
  0xb1   : > { %1339 = vrot.lane.b32.xlu0 %v1334_v21, %s2572_s25  ;;  %1337 = vrot.lane.b32.xlu1 %v1333_v20, %s2572_s25 }
  0xb2   : > { %v1401_v22 = vpop.permute.xlu1 %1400  ;;  %v1356_v23 = vpop.permute.xlu0 %1355 }
  0xb3   : > { %v1359_v25 = vmul.f32 %v2777_v43, %v1356_v23  ;;  %v1408_v29 = vmul.f32 %v2777_v43, %v1401_v22 }
  0xb5   : > { %1364 = vrot.lane.b32.xlu0 %v1359_v25, %s2571_s24  ;;  %1362 = vrot.lane.b32.xlu1 %v1358_v24, %s2571_s24 }
  0xb6   : > { %v1426_v26 = vpop.permute.xlu1 %1425  ;;  %v1381_v27 = vpop.permute.xlu0 %1380 }
  0xb7   : > { %v1433_v32 = vmul.f32 %v2777_v43, %v1426_v26  ;;  %v1384_v33 = vmul.f32 %v2777_v43, %v1381_v27 }
  0xb9   : > { %1412 = vrot.lane.b32.xlu0 %v1408_v29, %s2574_s27  ;;  %1387 = vrot.lane.b32.xlu1 %v1383_v28, %s2573_s26 }
  0xba   : > { %v1451_v30 = vpop.permute.xlu1 %1450  ;;  %v1406_v31 = vpop.permute.xlu0 %1405 }
  0xbb   : > { %v1458_v34 = vmul.f32 %v2777_v43, %v1451_v30  ;;  %v1409_v35 = vmul.f32 %v2777_v43, %v1406_v31 }
  0xbd   : > { %1437 = vrot.lane.b32.xlu0 %v1433_v32, %s2575_s28  ;;  %1389 = vrot.lane.b32.xlu1 %v1384_v33, %s2573_s26 }
  0xbe   : > { %v1456_v36 = vpop.permute.xlu1 %1455  ;;  %v1431_v37 = vpop.permute.xlu0 %1430 }
  0xbf   : > { %v1459_v38 = vmul.f32 %v2777_v43, %v1456_v36  ;;  %v1434_v39 = vmul.f32 %v2777_v43, %v1431_v37 }
  0xc1   : > { %1414 = vrot.lane.b32.xlu0 %v1409_v35, %s2574_s27  ;;  %1462 = vrot.lane.b32.xlu1 %v1458_v34, %s2576_s29 }
  0xc2   : > { %v339_v40 = vpop.permute.xlu0 %338  ;;  %v754_v41 = vpop.permute.xlu1 %753 }
  0xc3   : > { %v352_v53 = vmul.f32 %v2777_v43, %v339_v40  ;;  %v761_v7 = vmul.f32 %v2777_v43, %v754_v41 }
  0xc5   : > { %1439 = vrot.lane.b32.xlu0 %v1434_v39, %s2575_s28  ;;  %1464 = vrot.lane.b32.xlu1 %v1459_v38, %s2576_s29 }
  0xc6   : > { %v344_v42 = vpop.permute.xlu0 %343  ;;  %v759_v44 = vpop.permute.xlu1 %758 }
  0xc7   : > { %v353_v59 = vmul.f32 %v2777_v43, %v344_v42  ;;  %v762_v11 = vmul.f32 %v2777_v43, %v759_v44 }
  0xca   : > { %v409_v45 = vpop.permute.xlu0 %408  ;;  %v899_v46 = vpop.permute.xlu1 %898 }
  0xce   : > { %v414_v47 = vpop.permute.xlu0 %413  ;;  %v2839_v48 = vpop.permute.xlu1 %1475 }
  0xd2   : > { %v1261_v49 = vpop.permute.xlu0 %1260  ;;  %v2841_v50 = vpop.permute.xlu1 %1480 }
  0xd3   : > { %v1268_v33 = vmul.f32 %v2777_v43, %v1261_v49 }
  0xd6   : > { %v894_v51 = vpop.permute.xlu0 %893 }
  0xda   : > { %v1266_v54 = vpop.permute.xlu0 %1265 }
  0xdb   : > { %v1269_v41 = vmul.f32 %v2777_v43, %v1266_v54 }
  0xfb   : > { %v372_v52 = vpop.permute.xlu1 %371  ;;  %v781_v58 = vpop.permute.xlu0 %780 }
  0xfc   : > { %v377_v55 = vadd.f32 %v372_v52, %v352_v53  ;;  %v786_v8 = vadd.f32 %v781_v58, %v761_v7 }
  0xff   : > { %v397_v56 = vpop.permute.xlu1 %396 }
 0x100   : > { %v402_v57 = vadd.f32 %v397_v56, %v377_v55 }
 0x102   : > { %v416_v60 = vadd.f32 %v409_v45, %v402_v57 }
 0x103   : > { %v374_v61 = vpop.permute.xlu1 %373  ;;  %v399_v0 = vpop.permute.xlu0 %398 }
 0x104   : > { %v418_v62 = vmax.f32 %v416_v60, 0.0  ;;  %v378_v63 = vadd.f32 %v374_v61, %v353_v59 }
 0x106   : > { %v403_v1 = vadd.f32 %v399_v0, %v378_v63  ;;  %422 = vrot.lane.b32.xlu0 %v418_v62, %s2570_s23 }
 0x107   : > { %v806_v2 = vpop.permute.xlu1 %805 }
 0x108   : > { %v417_v3 = vadd.f32 %v414_v47, %v403_v1  ;;  %v811_v12 = vadd.f32 %v806_v2, %v786_v8 }
 0x10a   : > { %v419_v4 = vmax.f32 %v417_v3, 0.0 }
 0x10b   : > { %v856_v5 = vpop.permute.xlu0 %855  ;;  %v783_v6 = vpop.permute.xlu1 %782 }
 0x10c   : > { %424 = vrot.lane.b32.xlu1 %v419_v4, %s2570_s23  ;;  %v787_v13 = vadd.f32 %v783_v6, %v762_v11 }
 0x10f   : > { %v833_v9 = vpop.permute.xlu0 %832  ;;  %v831_v10 = vpop.permute.xlu1 %830 }
 0x110   : > { %v836_v14 = vadd.f32 %v831_v10, %v811_v12 }
 0x112   : > { %v861_v19 = vadd.f32 %v856_v5, %v836_v14 }
 0x113   : > { %v858_v15 = vpop.permute.xlu0 %857  ;;  %v808_v16 = vpop.permute.xlu1 %807 }
 0x114   : > { %v812_v17 = vadd.f32 %v808_v16, %v787_v13 }
 0x116   : > { %v837_v18 = vadd.f32 %v833_v9, %v812_v17 }
 0x117   : > { %v883_v20 = vpop.permute.xlu0 %882  ;;  %v881_v21 = vpop.permute.xlu1 %880 }
 0x118   : > { %v862_v22 = vadd.f32 %v858_v15, %v837_v18  ;;  %v886_v23 = vadd.f32 %v881_v21, %v861_v19  ;;  %v457_v15 = vld [vmem:[%s3179_s3] sm:$0xff] }
 0x119   : > { %2203 = vmatprep.mubr.msk.f32.mxu0 %vm485_vm4, %v457_v15 }
 0x11a   : > { %v887_v24 = vadd.f32 %v883_v20, %v862_v22  ;;  %v901_v25 = vadd.f32 %v894_v51, %v886_v23 }
 0x11b   : > { %v1290_v26 = vpop.permute.xlu0 %1289  ;;  %v1288_v27 = vpop.permute.xlu1 %1287 }
 0x11c   : > { %v902_v28 = vadd.f32 %v899_v46, %v887_v24  ;;  %v903_v29 = vmax.f32 %v901_v25, 0.0  ;;  %v1293_v36 = vadd.f32 %v1288_v27, %v1268_v33  ;;  %v1294_v46 = vadd.f32 %v1290_v26, %v1269_v41 }
 0x11e   : > { %v904_v30 = vmax.f32 %v902_v28, 0.0  ;;  %907 = vrot.lane.b32.xlu0 %v903_v29, %s2577_s11 }
 0x11f   : > { %v1315_v31 = vpop.permute.xlu0 %1314  ;;  %v1313_v32 = vpop.permute.xlu1 %1312 }
 0x120   : > { %909 = vrot.lane.b32.xlu1 %v904_v30, %s2577_s11  ;;  %v1318_v37 = vadd.f32 %v1313_v32, %v1293_v36  ;;  %v1319_v51 = vadd.f32 %v1315_v31, %v1294_v46 }
 0x123   : > { %v1340_v34 = vpop.permute.xlu0 %1339  ;;  %v1338_v35 = vpop.permute.xlu1 %1337 }
 0x124   : > { %v1343_v40 = vadd.f32 %v1338_v35, %v1318_v37  ;;  %v1344_v56 = vadd.f32 %v1340_v34, %v1319_v51 }
 0x127   : > { %v1365_v38 = vpop.permute.xlu0 %1364  ;;  %v1363_v39 = vpop.permute.xlu1 %1362 }
 0x128   : > { %v1368_v42 = vadd.f32 %v1363_v39, %v1343_v40  ;;  %v1369_v49 = vadd.f32 %v1365_v38, %v1344_v56 }
 0x12b   : > { %v1413_v44 = vpop.permute.xlu0 %1412  ;;  %v1388_v45 = vpop.permute.xlu1 %1387 }
 0x12c   : > { %v1393_v47 = vadd.f32 %v1388_v45, %v1368_v42 }
 0x12e   : > { %v1418_v52 = vadd.f32 %v1413_v44, %v1393_v47 }
 0x12f   : > { %v1438_v53 = vpop.permute.xlu0 %1437  ;;  %v1390_v55 = vpop.permute.xlu1 %1389 }
 0x130   : > { %v1443_v57 = vadd.f32 %v1438_v53, %v1418_v52  ;;  %v1394_v60 = vadd.f32 %v1390_v55, %v1369_v49 }
 0x133   : > { %v1415_v58 = vpop.permute.xlu0 %1414  ;;  %v1463_v59 = vpop.permute.xlu1 %1462 }
 0x134   : > { %v1468_v61 = vadd.f32 %v1463_v59, %v1443_v57  ;;  %v1419_v62 = vadd.f32 %v1415_v58, %v1394_v60  ;;  %v462_v60 = vld [vmem:[%s3180_s4 + $0x8] sm:$0xff] }
 0x136   : > { %v1483_v63 = vadd.f32 %v2839_v48, %v1468_v61  ;;  %v461_v61 = vld [vmem:[%s3180_s4] sm:$0xff] }
 0x137   : > { %v1440_v43 = vpop.permute.xlu0 %1439  ;;  %v1465_v1 = vpop.permute.xlu1 %1464 }
 0x138   : > { %v1485_v54 = vmax.f32 %v1483_v63, 0.0  ;;  %v1444_v0 = vadd.f32 %v1440_v43, %v1419_v62  ;;  %v464_v62 = vld [vmem:[%s3180_s4 + $0x18] sm:$0xff]  ;;  %v463_v63 = vld [vmem:[%s3180_s4 + $0x10] sm:$0xff]  ;;  %v2036_v43 = vld [vmem:[%s3180_s4 + $0x28] sm:$0xff] }
 0x13a   : > { %v1469_v2 = vadd.f32 %v1465_v1, %v1444_v0  ;;  %1489 = vrot.lane.b32.xlu0 %v1485_v54, %s2578_s12  ;;  %v2035_v54 = vld [vmem:[%s3180_s4 + $0x20] sm:$0xff]  ;;  %v2038_v0 = vld [vmem:[%s3180_s4 + $0x38] sm:$0xff]  ;;  %v2037_v1 = vld [vmem:[%s3180_s4 + $0x30] sm:$0xff] }
 0x13c   : > { %v1484_v3 = vadd.f32 %v2841_v50, %v1469_v2  ;;  %v2086_v2 = vld [vmem:[%s3180_s4 + $0x48] sm:$0xff] }
 0x13e   : > { %v1486_v4 = vmax.f32 %v1484_v3, 0.0  ;;  %v2085_v3 = vld [vmem:[%s3180_s4 + $0x40] sm:$0xff] }
 0x140   : > { %1491 = vrot.lane.b32.xlu1 %v1486_v4, %s2578_s12  ;;  %v2088_v4 = vld [vmem:[%s3180_s4 + $0x58] sm:$0xff] }
 0x178   : > { %v423_v5 = vpop.permute.xlu0 %422 }
 0x179   : > { %v2853_v6 = vsel %vm428_vm0, 0.0, %v423_v5  ;;  %v2087_v5 = vld [vmem:[%s3180_s4 + $0x50] sm:$0xff] }
 0x17a   : > { %v432_v7 = vsel %vm431_vm1, %v2853_v6, 0.0 }
 0x17b   : > { %v437_v10 = vrot.slane %v432_v7, 6  ;;  %v447_v11 = vrot.slane %v432_v7, 4 }
 0x17e   : > { %v425_v48 = vpop.permute.xlu1 %424 }
 0x17f   : > { %v430_v8 = vsel %vm428_vm0, 0.0, %v425_v48  ;;  %vm2411_vm0 = vmpackc.low %vm436_vm3, %vm2579_vm9 }
 0x180   : > { %v2858_v9 = vsel %vm431_vm1, %v430_v8, 0.0  ;;  %vm590_vm1 = vcmask 261120  }
 0x181   : > { %v438_v50 = vrot.slane %v2858_v9, 6  ;;  %v448_v12 = vrot.slane %v2858_v9, 4 }
 0x183   : > { %v449_v13 = vsel %vm446_vm2, %v447_v11, %v448_v12  ;;  %v439_v14 = vsel %vm436_vm3, %v437_v10, %v438_v50 }
 0x184   : > { %v2490_v16 = vpack.i.bf16 %v449_v13, %v447_v11  ;;  %v2485_v17 = vpack.i.bf16 %v439_v14, %v437_v10 }
 0x186   : > { %2491 = vrot.lane.b32.xlu1 %v2490_v16, %s2570_s23  ;;  %2486 = vrot.lane.b32.xlu0 %v2485_v17, %s2569_s22  ;;  %v458_v16 = vld [vmem:[%s3179_s3 + $0x8] sm:$0xff]  ;;  %v2031_v17 = vld [vmem:[%s3179_s3 + $0x20] sm:$0xff] }
 0x190   : > { %v908_v18 = vpop.permute.xlu0 %907 }
 0x191   : > { %v2870_v19 = vsel %vm913_vm5, 0.0, %v908_v18 }
 0x192   : > { %v917_v20 = vsel %vm916_vm6, %v2870_v19, 0.0  ;;  %v910_v21 = vpop.permute.xlu1 %909 }
 0x193   : > { %v915_v22 = vsel %vm913_vm5, 0.0, %v910_v21  ;;  %v921_v23 = vrot.slane %v917_v20, 6  ;;  %v930_v25 = vrot.slane %v917_v20, 4  ;;  %v939_v29 = vrot.slane %v917_v20, 2 }
 0x194   : > { %v2875_v24 = vsel %vm916_vm6, %v915_v22, 0.0 }
 0x195   : > { %v922_v26 = vrot.slane %v2875_v24, 6  ;;  %v931_v27 = vrot.slane %v2875_v24, 4  ;;  %v940_v28 = vrot.slane %v2875_v24, 2  ;;  %v2510_v35 = vpack.i.bf16 %v2875_v24, %v917_v20 }
 0x197   : > { %v932_v30 = vsel %vm446_vm2, %v930_v25, %v931_v27  ;;  %v923_v31 = vsel %vm436_vm3, %v921_v23, %v922_v26  ;;  %v941_v34 = vsel %vm498_vm7, %v939_v29, %v940_v28 }
 0x198   : > { %v2500_v32 = vpack.i.bf16 %v932_v30, %v930_v25  ;;  %v2495_v33 = vpack.i.bf16 %v923_v31, %v921_v23  ;;  %v2505_v36 = vpack.i.bf16 %v941_v34, %v939_v29 }
 0x19a   : > { %2501 = vrot.lane.b32.xlu1 %v2500_v32, %s2570_s23  ;;  %2496 = vrot.lane.b32.xlu0 %v2495_v33, %s2569_s22 }
 0x19e   : > { %2511 = vrot.lane.b32.xlu1 %v2510_v35, %s2571_s24  ;;  %2506 = vrot.lane.b32.xlu0 %v2505_v36, %s2572_s25 }
 0x1a2   : > { %2516 = vrot.lane.b32.xlu0 %v2495_v33, %s2573_s26 }
 0x1ac   : > { %v1490_v37 = vpop.permute.xlu0 %1489 }
 0x1ad   : > { %v2889_v38 = vsel %vm1495_vm8, 0.0, %v1490_v37 }
 0x1ae   : > { %v1498_v39 = vsel %vm916_vm6, %v2889_v38, 0.0 }
 0x1af   : > { %v1502_v42 = vrot.slane %v1498_v39, 6  ;;  %v1511_v45 = vrot.slane %v1498_v39, 4  ;;  %v1520_v52 = vrot.slane %v1498_v39, 2 }
 0x1b2   : > { %v1492_v40 = vpop.permute.xlu1 %1491 }
 0x1b3   : > { %v1497_v41 = vsel %vm1495_vm8, 0.0, %v1492_v40 }
 0x1b4   : > { %v2894_v44 = vsel %vm916_vm6, %v1497_v41, 0.0 }
 0x1b5   : > { %v1512_v46 = vrot.slane %v2894_v44, 4  ;;  %v1503_v47 = vrot.slane %v2894_v44, 6  ;;  %v1521_v51 = vrot.slane %v2894_v44, 2  ;;  %v2535_v58 = vpack.i.bf16 %v2894_v44, %v1498_v39 }
 0x1b7   : > { %v1513_v53 = vsel %vm446_vm2, %v1511_v45, %v1512_v46  ;;  %v1504_v55 = vsel %vm436_vm3, %v1502_v42, %v1503_v47  ;;  %v1522_v57 = vsel %vm498_vm7, %v1520_v52, %v1521_v51  ;;  %v2033_v46 = vld [vmem:[%s3179_s3 + $0x30] sm:$0xff]  ;;  %v2034_v47 = vld [vmem:[%s3179_s3 + $0x38] sm:$0xff]  ;;  %v2081_v51 = vld [vmem:[%s3179_s3 + $0x40] sm:$0xff] }
 0x1b8   : > { %v2525_v56 = vpack.i.bf16 %v1513_v53, %v1511_v45  ;;  %v2520_v49 = vpack.i.bf16 %v1504_v55, %v1502_v42  ;;  %v2530_v59 = vpack.i.bf16 %v1522_v57, %v1520_v52  ;;  %v2032_v45 = vld [vmem:[%s3179_s3 + $0x28] sm:$0xff] }
 0x1ba   : > { %2526 = vrot.lane.b32.xlu0 %v2525_v56, %s2570_s23  ;;  %2521 = vrot.lane.b32.xlu1 %v2520_v49, %s2569_s22 }
 0x1be   : > { %2536 = vrot.lane.b32.xlu0 %v2535_v58, %s2571_s24  ;;  %2531 = vrot.lane.b32.xlu1 %v2530_v59, %s2572_s25 }
 0x1c2   : > { %2546 = vrot.lane.b32.xlu0 %v2525_v56, %s2574_s27  ;;  %2541 = vrot.lane.b32.xlu1 %v2520_v49, %s2573_s26 }
 0x1c6   : > { %2556 = vrot.lane.b32.xlu0 %v2535_v58, %s2576_s29  ;;  %2551 = vrot.lane.b32.xlu1 %v2530_v59, %s2575_s28 }
 0x1ca   : > { %472 = vperm.xlu0 %2483, %v462_v60   ;;  %467 = vperm.xlu1 %2484, %v461_v61  }
 0x1ce   : > { %482 = vperm.xlu0 %2483, %v464_v62   ;;  %477 = vperm.xlu1 %2484, %v463_v63  }
 0x1d2   : > { %980 = vperm.xlu0 %2483, %v2036_v43   ;;  %975 = vperm.xlu1 %2484, %v2035_v54  }
 0x1d6   : > { %990 = vperm.xlu0 %2483, %v2038_v0   ;;  %985 = vperm.xlu1 %2484, %v2037_v1  }
 0x1da   : > { %1581 = vperm.xlu0 %2483, %v2086_v2   ;;  %1576 = vperm.xlu1 %2484, %v2085_v3  }
 0x1de   : > { %1591 = vperm.xlu0 %2483, %v2088_v4   ;;  %1586 = vperm.xlu1 %2484, %v2087_v5  }
 0x1f8   : > { %v2492_v7 = vpop.permute.xlu1 %2491  ;;  %v2487_v48 = vpop.permute.xlu0 %2486 }
 0x1f9   : > { %v2493_v8 = vunpack.i.l.bf16 %v2492_v7  ;;  %v2489_v10 = vunpack.i.h.bf16 %v2487_v48  ;;  %v2488_v11 = vunpack.i.l.bf16 %v2487_v48  ;;  %v2494_v50 = vunpack.i.h.bf16 %v2492_v7 }
 0x1fb   : > { %v456_v12 = vsel %vm446_vm2, %v2489_v10, %v2493_v8  ;;  %v455_v13 = vsel %vm436_vm3, %v2858_v9, %v2488_v11  ;;  %v459_v9 = vld [vmem:[%s3179_s3 + $0x10] sm:$0xff] }
 0x1fc   : > { %v2340_v14 = vpack.c.bf16 %v455_v13, %v2853_v6  ;;  %v2346_v15 = vpack.c.bf16 %v2494_v50, %v456_v12  ;;  %v460_v6 = vld [vmem:[%s3179_s3 + $0x18] sm:$0xff] }
 0x1fe   : > { %2342 = vmatprep.subr.msk.bf16.mxu0 %vm2341_vm10, %v2340_v14 }
 0x1ff   : > { %2345 = vmatpush3.bf16.msk.msra.mxu0 %vm2341_vm10, %v2340_v14 }
 0x200   : > { %2348 = vmatprep.subr.msk.bf16.mxu0 %vm2347_vm11, %v2346_v15 }
 0x203   : > { %2351 = vmatpush3.bf16.msk.msra.mxu0 %vm2347_vm11, %v2346_v15 }
 0x206   : > { %2204 = vmatmul.mubr.msk.f32.vlgmr.msra.gmra.mrb[0].mxu0 %vm485_vm4, %v458_v16 }
 0x207   : > { %2206 = vmatprep.mubr.msk.f32.mxu0 %vm485_vm4, %v459_v9 }
 0x20a   : > { %2207 = vmatmul.mubr.msk.f32.gmra.mrb[2].mxu0 %vm485_vm4, %v460_v6  ;;  %vm1940_vm4 = vcmask 1024  }
 0x20b   : > { %2245 = vmatprep.mubr.msk.f32.mxu0 %vm993_vm12, %v2031_v17 }
 0x20c   : > { %v2502_v18 = vpop.permute.xlu1 %2501  ;;  %v2497_v20 = vpop.permute.xlu0 %2496 }
 0x20d   : > { %v2498_v21 = vunpack.i.l.bf16 %v2497_v20  ;;  %v2503_v22 = vunpack.i.l.bf16 %v2502_v18  ;;  %v2499_v23 = vunpack.i.h.bf16 %v2497_v20  ;;  %v2504_v30 = vunpack.i.h.bf16 %v2502_v18  ;;  %v2082_v18 = vld [vmem:[%s3179_s3 + $0x48] sm:$0xff]  ;;  %v2083_v20 = vld [vmem:[%s3179_s3 + $0x50] sm:$0xff] }
 0x20f   : > { %v959_v25 = vsel %vm436_vm3, %v2875_v24, %v2498_v21  ;;  %v960_v24 = vsel %vm446_vm2, %v2499_v23, %v2503_v22  ;;  %v2084_v21 = vld [vmem:[%s3179_s3 + $0x58] sm:$0xff] }
 0x210   : > { %v2360_v27 = vpack.c.bf16 %v959_v25, %v2870_v19  ;;  %v2512_v28 = vpop.permute.xlu1 %2511  ;;  %v2507_v29 = vpop.permute.xlu0 %2506 }
 0x211   : > { %v2508_v31 = vunpack.i.l.bf16 %v2507_v29  ;;  %v2513_v32 = vunpack.i.l.bf16 %v2512_v28  ;;  %v2509_v33 = vunpack.i.h.bf16 %v2507_v29  ;;  %v2514_v37 = vunpack.i.h.bf16 %v2512_v28 }
 0x212   : > { %2362 = vmatprep.subr.msk.bf16.mxu0 %vm2975_vm13, %v2360_v27 }
 0x213   : > { %2365 = vmatpush3.bf16.msk.msra.mxu0 %vm2975_vm13, %v2360_v27  ;;  %v961_v34 = vsel %vm498_vm7, %v2504_v30, %v2508_v31  ;;  %v2370_v39 = vpack.c.bf16 %v2513_v32, %v2509_v33 }
 0x214   : > { %v2517_v35 = vpop.permute.xlu0 %2516  ;;  %v2366_v36 = vpack.c.bf16 %v961_v34, %v960_v24 }
 0x215   : > { %v2518_v19 = vunpack.i.l.bf16 %v2517_v35  ;;  %v2519_v40 = vunpack.i.h.bf16 %v2517_v35 }
 0x216   : > { %2367 = vmatprep.subr.bf16.mxu0 %v2366_v36 }
 0x217   : > { %v962_v41 = vsel %vm436_vm3, %v2514_v37, %v2518_v19  ;;  %2369 = vmatpush3.bf16.msra.mxu0 %v2366_v36 }
 0x218   : > { %2371 = vmatprep.subr.bf16.mxu0 %v2370_v39  ;;  %v2374_v42 = vpack.c.bf16 %v2519_v40, %v962_v41 }
 0x21b   : > { %2373 = vmatpush3.bf16.msra.mxu0 %v2370_v39 }
 0x21c   : > { %2376 = vmatprep.subr.msk.bf16.mxu0 %vm2375_vm14, %v2374_v42 }
 0x21f   : > { %2379 = vmatpush3.bf16.msk.msra.mxu0 %vm2375_vm14, %v2374_v42 }
 0x222   : > { %2246 = vmatmul.mubr.msk.f32.vlgmr.msra.gmra.mrb[4].mxu0 %vm993_vm12, %v2032_v45 }
 0x223   : > { %2248 = vmatprep.mubr.msk.f32.mxu0 %vm993_vm12, %v2033_v46 }
 0x226   : > { %2249 = vmatmul.mubr.msk.f32.gmra.mrb[6].mxu0 %vm993_vm12, %v2034_v47 }
 0x227   : > { %2295 = vmatprep.mubr.msk.f32.mxu0 %vm1594_vm15, %v2081_v51 }
 0x22c   : > { %v2522_v52 = vpop.permute.xlu1 %2521  ;;  %v2527_v53 = vpop.permute.xlu0 %2526 }
 0x22d   : > { %v2523_v55 = vunpack.i.l.bf16 %v2522_v52  ;;  %v2524_v56 = vunpack.i.h.bf16 %v2522_v52  ;;  %v2528_v57 = vunpack.i.l.bf16 %v2527_v53  ;;  %v2529_v61 = vunpack.i.h.bf16 %v2527_v53 }
 0x22f   : > { %v1558_v49 = vsel %vm436_vm3, %v2894_v44, %v2523_v55  ;;  %v1559_v54 = vsel %vm446_vm2, %v2524_v56, %v2528_v57 }
 0x230   : > { %v2388_v58 = vpack.c.bf16 %v1558_v49, %v2889_v38  ;;  %v2532_v59 = vpop.permute.xlu1 %2531  ;;  %v2537_v60 = vpop.permute.xlu0 %2536 }
 0x231   : > { %v2533_v62 = vunpack.i.l.bf16 %v2532_v59  ;;  %v2534_v63 = vunpack.i.h.bf16 %v2532_v59  ;;  %v2538_v43 = vunpack.i.l.bf16 %v2537_v60  ;;  %v2539_v38 = vunpack.i.h.bf16 %v2537_v60 }
 0x232   : > { %2390 = vmatprep.subr.msk.bf16.mxu0 %vm2975_vm13, %v2388_v58 }
 0x233   : > { %2393 = vmatpush3.bf16.msk.msra.mxu0 %vm2975_vm13, %v2388_v58  ;;  %v1560_v0 = vsel %vm498_vm7, %v2529_v61, %v2533_v62  ;;  %v2398_v7 = vpack.c.bf16 %v2538_v43, %v2534_v63 }
 0x234   : > { %v2542_v44 = vpop.permute.xlu1 %2541  ;;  %v2547_v1 = vpop.permute.xlu0 %2546  ;;  %v2394_v2 = vpack.c.bf16 %v1560_v0, %v1559_v54 }
 0x235   : > { %v2544_v3 = vunpack.i.h.bf16 %v2542_v44  ;;  %v2543_v4 = vunpack.i.l.bf16 %v2542_v44  ;;  %v2548_v5 = vunpack.i.l.bf16 %v2547_v1  ;;  %v2549_v11 = vunpack.i.h.bf16 %v2547_v1  ;;  %v603_v44 = vld [vmem:[%s3181_s5] sm:$0xff] }
 0x236   : > { %2395 = vmatprep.subr.bf16.mxu0 %v2394_v2  ;;  %2217 = vmatprep.mubr.msk.f32.mxu1 %vm590_vm1, %v603_v44  ;;  %v327_v44 = vld [vmem:[%s3182_s6 + $0x8] sm:$0xff] }
 0x237   : > { %2397 = vmatpush3.bf16.msra.mxu0 %v2394_v2  ;;  %v1561_v48 = vsel %vm436_vm3, %v2539_v38, %v2543_v4  ;;  %v1562_v8 = vsel %vm446_vm2, %v2544_v3, %v2548_v5  ;;  %vm2581_vm2 = vmmov 0   ;;  %vm1866_vm3 = vcmask 523264  }
 0x238   : > { %v2552_v10 = vpop.permute.xlu1 %2551  ;;  %2399 = vmatprep.subr.bf16.mxu0 %v2398_v7  ;;  %v2402_v13 = vpack.c.bf16 %v1562_v8, %v1561_v48  ;;  %v2557_v15 = vpop.permute.xlu0 %2556 }
 0x239   : > { %v2553_v50 = vunpack.i.l.bf16 %v2552_v10  ;;  %v2554_v12 = vunpack.i.h.bf16 %v2552_v10  ;;  %v2559_v9 = vunpack.i.h.bf16 %v2557_v15  ;;  %v2558_v6 = vunpack.i.l.bf16 %v2557_v15 }
 0x23b   : > { %v1563_v14 = vsel %vm498_vm7, %v2549_v11, %v2553_v50  ;;  %2401 = vmatpush3.bf16.msra.mxu0 %v2398_v7  ;;  %v2410_v17 = vpack.c.bf16 %v2559_v9, %v2558_v6 }
 0x23c   : > { %2403 = vmatprep.subr.bf16.mxu0 %v2402_v13  ;;  %v2406_v16 = vpack.c.bf16 %v2554_v12, %v1563_v14 }
 0x23f   : > { %2405 = vmatpush3.bf16.msra.mxu0 %v2402_v13 }
 0x240   : > { %2407 = vmatprep.subr.bf16.mxu0 %v2406_v16 }
 0x243   : > { %2409 = vmatpush3.bf16.msra.mxu0 %v2406_v16 }
 0x244   : > { %2412 = vmatprep.subr.msk.bf16.mxu0 %vm2411_vm0, %v2410_v17 }
 0x247   : > { %2415 = vmatpush3.bf16.msk.msra.mxu0 %vm2411_vm0, %v2410_v17 }
 0x249   : > { %v473_v22 = vpop.permute.xlu0 %472  ;;  %v468_v23 = vpop.permute.xlu1 %467 }
 0x24a   : > { %2296 = vmatmul.mubr.msk.f32.vlgmr.msra.gmra.mrb[8].mxu0 %vm1594_vm15, %v2082_v18 }
 0x24b   : > { %2298 = vmatprep.mubr.msk.f32.mxu0 %vm1594_vm15, %v2083_v20 }
 0x24d   : > { %v483_v30 = vpop.permute.xlu0 %482  ;;  %v478_v33 = vpop.permute.xlu1 %477 }
 0x24e   : > { %2299 = vmatmul.mubr.msk.f32.gmra.mrb[10].mxu0 %vm1594_vm15, %v2084_v21 }
 0x251   : > { %v981_v42 = vpop.permute.xlu0 %980  ;;  %v976_v45 = vpop.permute.xlu1 %975 }
 0x255   : > { %v991_v55 = vpop.permute.xlu0 %990  ;;  %v986_v57 = vpop.permute.xlu1 %985 }
 0x259   : > { %v1582_v1 = vpop.permute.xlu0 %1581  ;;  %v1577_v2 = vpop.permute.xlu1 %1576 }
 0x25d   : > { %v1592_v48 = vpop.permute.xlu0 %1591  ;;  %v1587_v11 = vpop.permute.xlu1 %1586 }
 0x2d9   : > { %v2205_v25 = vpop.f32.mrb[0].mxu0 }
 0x2da   : > { %v573_v26 = vadd.f32 %v2205_v25, %v473_v22  ;;  %v567_v27 = vpop.f32.mrb[1].mxu0 }
 0x2db   : > { %v568_v28 = vadd.f32 %v567_v27, %v468_v23  ;;  %v605_v27 = vld [vmem:[%s3181_s5 + $0x10] sm:$0xff] }
 0x2dc   : > { %v587_v29 = vmax.f32 %v573_v26, 0.0  ;;  %v604_v26 = vld [vmem:[%s3181_s5 + $0x8] sm:$0xff] }
 0x2dd   : > { %v586_v31 = vmax.f32 %v568_v28, 0.0  ;;  %v2208_v32 = vpop.f32.mrb[2].mxu0  ;;  %v606_v28 = vld [vmem:[%s3181_s5 + $0x18] sm:$0xff] }
 0x2de   : > { %v583_v24 = vadd.f32 %v2208_v32, %v483_v30  ;;  %v577_v34 = vpop.f32.mrb[3].mxu0  ;;  %v594_v35 = vsel %vm590_vm1, %v587_v29, -inf  ;;  %v607_v29 = vld [vmem:[%s3181_s5 + $0x20] sm:$0xff]  ;;  %v608_v30 = vld [vmem:[%s3181_s5 + $0x28] sm:$0xff]  ;;  %v610_v32 = vld [vmem:[%s3181_s5 + $0x38] sm:$0xff] }
 0x2df   : > { %v578_v36 = vadd.f32 %v577_v34, %v478_v33  ;;  %595 = vmax.xlane.f32.xlu0 %v594_v35  ;;  %v591_v37 = vsel %vm590_vm1, %v586_v31, -inf  ;;  %v609_v31 = vld [vmem:[%s3181_s5 + $0x30] sm:$0xff]  ;;  %v2045_v33 = vld [vmem:[%s3181_s5 + $0x40] sm:$0xff] }
 0x2e0   : > { %v589_v19 = vmax.f32 %v583_v24, 0.0  ;;  %592 = vmax.xlane.f32.xlu1 %v591_v37 }
 0x2e1   : > { %v588_v39 = vmax.f32 %v578_v36, 0.0 }
 0x2e2   : > { %v600_v40 = vsel %vm590_vm1, %v589_v19, -inf }
 0x2e3   : > { %v597_v41 = vsel %vm590_vm1, %v588_v39, -inf  ;;  %v2046_v39 = vld [vmem:[%s3181_s5 + $0x48] sm:$0xff] }
 0x2e4   : > { %598 = vmax.xlane.f32.xlu0 %v597_v41  ;;  %601 = vmax.xlane.f32.xlu1 %v600_v40  ;;  %v2047_v40 = vld [vmem:[%s3181_s5 + $0x50] sm:$0xff]  ;;  %v2048_v41 = vld [vmem:[%s3181_s5 + $0x58] sm:$0xff] }
 0x2f5   : > { %v2247_v46 = vpop.f32.mrb[4].mxu0 }
 0x2f6   : > { %v1080_v47 = vadd.f32 %v2247_v46, %v981_v42  ;;  %v1074_v51 = vpop.f32.mrb[5].mxu0  ;;  %v2049_v42 = vld [vmem:[%s3181_s5 + $0x60] sm:$0xff]  ;;  %v2051_v46 = vld [vmem:[%s3181_s5 + $0x70] sm:$0xff] }
 0x2f7   : > { %v1075_v52 = vadd.f32 %v1074_v51, %v976_v45  ;;  %v2050_v45 = vld [vmem:[%s3181_s5 + $0x68] sm:$0xff]  ;;  %v2095_v51 = vld [vmem:[%s3181_s5 + $0x80] sm:$0xff] }
 0x2f8   : > { %v1094_v53 = vmax.f32 %v1080_v47, 0.0  ;;  %v2052_v47 = vld [vmem:[%s3181_s5 + $0x78] sm:$0xff] }
 0x2f9   : > { %v1093_v56 = vmax.f32 %v1075_v52, 0.0  ;;  %v2250_v49 = vpop.f32.mrb[6].mxu0 }
 0x2fa   : > { %v1090_v58 = vadd.f32 %v2250_v49, %v991_v55  ;;  %v1084_v59 = vpop.f32.mrb[7].mxu0  ;;  %v1100_v60 = vsel %vm590_vm1, %v1094_v53, -inf }
 0x2fb   : > { %v1085_v61 = vadd.f32 %v1084_v59, %v986_v57  ;;  %1101 = vmax.xlane.f32.xlu1 %v1100_v60  ;;  %v1097_v62 = vsel %vm590_vm1, %v1093_v56, -inf  ;;  %v2097_v59 = vld [vmem:[%s3181_s5 + $0x90] sm:$0xff]  ;;  %v2098_v60 = vld [vmem:[%s3181_s5 + $0x98] sm:$0xff] }
 0x2fc   : > { %v1096_v63 = vmax.f32 %v1090_v58, 0.0  ;;  %1098 = vmax.xlane.f32.xlu0 %v1097_v62  ;;  %v2096_v58 = vld [vmem:[%s3181_s5 + $0x88] sm:$0xff] }
 0x2fd   : > { %v1095_v43 = vmax.f32 %v1085_v61, 0.0  ;;  %v2099_v61 = vld [vmem:[%s3181_s5 + $0xa0] sm:$0xff]  ;;  %v2100_v62 = vld [vmem:[%s3181_s5 + $0xa8] sm:$0xff] }
 0x2fe   : > { %v1106_v54 = vsel %vm590_vm1, %v1096_v63, -inf  ;;  %v2101_v63 = vld [vmem:[%s3181_s5 + $0xb0] sm:$0xff] }
 0x2ff   : > { %1107 = vmax.xlane.f32.xlu1 %v1106_v54  ;;  %v1103_v0 = vsel %vm590_vm1, %v1095_v43, -inf  ;;  %v2102_v43 = vld [vmem:[%s3181_s5 + $0xb8] sm:$0xff]  ;;  %v2580_v54 = vmov 0.0|0.0  }
 0x300   : > { %1104 = vmax.xlane.f32.xlu0 %v1103_v0  ;;  %v2582_v0 = vmov 0.0  }
 0x31d   : > { %v2297_v38 = vpop.f32.mrb[8].mxu0 }
 0x31e   : > { %v1681_v3 = vadd.f32 %v2297_v38, %v1582_v1  ;;  %v1675_v4 = vpop.f32.mrb[9].mxu0  ;;  %v326_v1 = vld [vmem:[%s3182_s6] sm:$0xff] }
 0x31f   : > { %v1676_v5 = vadd.f32 %v1675_v4, %v1577_v2 }
 0x320   : > { %v1695_v7 = vmax.f32 %v1681_v3, 0.0 }
 0x321   : > { %v1694_v8 = vmax.f32 %v1676_v5, 0.0  ;;  %v2300_v10 = vpop.f32.mrb[10].mxu0  ;;  %v329_v5 = vld [vmem:[%s3182_s6 + $0x18] sm:$0xff] }
 0x322   : > { %v1691_v50 = vadd.f32 %v2300_v10, %v1592_v48  ;;  %v1685_v12 = vpop.f32.mrb[11].mxu0  ;;  %v1701_v13 = vsel %vm590_vm1, %v1695_v7, -inf  ;;  %v328_v48 = vld [vmem:[%s3182_s6 + $0x10] sm:$0xff] }
 0x323   : > { %v1686_v14 = vadd.f32 %v1685_v12, %v1587_v11  ;;  %1702 = vmax.xlane.f32.xlu1 %v1701_v13  ;;  %v1698_v15 = vsel %vm590_vm1, %v1694_v8, -inf }
 0x324   : > { %v1697_v16 = vmax.f32 %v1691_v50, 0.0  ;;  %1699 = vmax.xlane.f32.xlu0 %v1698_v15 }
 0x325   : > { %v1696_v9 = vmax.f32 %v1686_v14, 0.0  ;;  %v331_v14 = vld [vmem:[%s3182_s6 + $0x28] sm:$0xff] }
 0x326   : > { %v1707_v6 = vsel %vm590_vm1, %v1697_v16, -inf  ;;  %v330_v16 = vld [vmem:[%s3182_s6 + $0x20] sm:$0xff] }
 0x327   : > { %1708 = vmax.xlane.f32.xlu1 %v1707_v6  ;;  %v1704_v17 = vsel %vm590_vm1, %v1696_v9, -inf }
 0x328   : > { %1705 = vmax.xlane.f32.xlu0 %v1704_v17 }
 0x36c   : > { %v596_v18 = vpop.xlane.xlu0 %595 }
 0x36d   : > { %v593_v20 = vpop.xlane.xlu1 %592 }
 0x36e   : > { %v2352_v21 = vpack.c.bf16 %v596_v18, %v593_v20 }
 0x370   : > { %2353 = vmatprep.subr.bf16.mxu1 %v2352_v21 }
 0x371   : > { %v599_v22 = vpop.xlane.xlu0 %598  ;;  %2355 = vmatpush3.bf16.msra.mxu1 %v2352_v21  ;;  %v602_v23 = vpop.xlane.xlu1 %601 }
 0x372   : > { %v2356_v25 = vpack.c.bf16 %v602_v23, %v599_v22  ;;  %v333_v22 = vld [vmem:[%s3182_s6 + $0x38] sm:$0xff] }
 0x374   : > { %2357 = vmatprep.subr.bf16.mxu1 %v2356_v25 }
 0x375   : > { %2359 = vmatpush3.bf16.msra.mxu1 %v2356_v25  ;;  %v332_v25 = vld [vmem:[%s3182_s6 + $0x30] sm:$0xff] }
 0x378   : > { %2218 = vmatmul.mubr.msk.f32.vlgmr.msra.gmra.mrb[0].mxu1 %vm590_vm1, %v604_v26 }
 0x379   : > { %2220 = vmatprep.mubr.msk.f32.mxu1 %vm590_vm1, %v605_v27 }
 0x37c   : > { %2221 = vmatmul.mubr.msk.f32.gmra.mrb[2].mxu1 %vm590_vm1, %v606_v28 }
 0x37d   : > { %2223 = vmatprep.mubr.msk.f32.mxu1 %vm590_vm1, %v607_v29 }
 0x380   : > { %2224 = vmatmul.mubr.msk.f32.gmra.mrb[4].mxu1 %vm590_vm1, %v608_v30 }
 0x381   : > { %2226 = vmatprep.mubr.msk.f32.mxu1 %vm590_vm1, %v609_v31 }
 0x384   : > { %2227 = vmatmul.mubr.msk.f32.gmra.mrb[6].mxu1 %vm590_vm1, %v610_v32 }
 0x385   : > { %2259 = vmatprep.mubr.msk.f32.mxu1 %vm590_vm1, %v2045_v33 }
 0x388   : > { %v1102_v24 = vpop.xlane.xlu1 %1101 }
 0x389   : > { %v1099_v34 = vpop.xlane.xlu0 %1098 }
 0x38a   : > { %v2380_v35 = vpack.c.bf16 %v1102_v24, %v1099_v34  ;;  %v1864_v34 = vld [vmem:[%s3183_s7] sm:$0x3] }
 0x38c   : > { %2381 = vmatprep.subr.bf16.mxu1 %v2380_v35  ;;  %v1108_v36 = vpop.xlane.xlu1 %1107 }
 0x38d   : > { %v1105_v37 = vpop.xlane.xlu0 %1104  ;;  %2383 = vmatpush3.bf16.msra.mxu1 %v2380_v35  ;;  %v1865_v35 = vld [vmem:[%s3184_s8] sm:$0x3] }
 0x38e   : > { %v2384_v19 = vpack.c.bf16 %v1108_v36, %v1105_v37 }
 0x390   : > { %2385 = vmatprep.subr.bf16.mxu1 %v2384_v19 }
 0x391   : > { %2387 = vmatpush3.bf16.msra.mxu1 %v2384_v19 }
 0x394   : > { %2260 = vmatmul.mubr.msk.f32.vlgmr.msra.gmra.mrb[0].mxu1 %vm590_vm1, %v2046_v39 }
 0x395   : > { %2262 = vmatprep.mubr.msk.f32.mxu1 %vm590_vm1, %v2047_v40 }
 0x398   : > { %2263 = vmatmul.mubr.msk.f32.gmra.mrb[2].mxu1 %vm590_vm1, %v2048_v41 }
 0x399   : > { %2265 = vmatprep.mubr.msk.f32.mxu1 %vm590_vm1, %v2049_v42 }
 0x39c   : > { %2266 = vmatmul.mubr.msk.f32.gmra.mrb[4].mxu1 %vm590_vm1, %v2050_v45 }
 0x39d   : > { %2268 = vmatprep.mubr.msk.f32.mxu1 %vm590_vm1, %v2051_v46 }
 0x3a0   : > { %2269 = vmatmul.mubr.msk.f32.gmra.mrb[6].mxu1 %vm590_vm1, %v2052_v47 }
 0x3a1   : > { %2309 = vmatprep.mubr.msk.f32.mxu1 %vm590_vm1, %v2095_v51 }
 0x3b0   : > { %v1703_v52 = vpop.xlane.xlu1 %1702 }
 0x3b1   : > { %v1700_v53 = vpop.xlane.xlu0 %1699 }
 0x3b2   : > { %v2416_v55 = vpack.c.bf16 %v1703_v52, %v1700_v53 }
 0x3b4   : > { %2417 = vmatprep.subr.bf16.mxu1 %v2416_v55  ;;  %v1709_v56 = vpop.xlane.xlu1 %1708 }
 0x3b5   : > { %v1706_v49 = vpop.xlane.xlu0 %1705  ;;  %2419 = vmatpush3.bf16.msra.mxu1 %v2416_v55 }
 0x3b6   : > { %v2420_v57 = vpack.c.bf16 %v1709_v56, %v1706_v49 }
 0x3b8   : > { %2421 = vmatprep.subr.bf16.mxu1 %v2420_v57 }
 0x3b9   : > { %2423 = vmatpush3.bf16.msra.mxu1 %v2420_v57 }
 0x3ba   : > { %2424 = vmatprep.subr.bf16.mxu1 %v2580_v54 }
 0x3bc   : > { %2310 = vmatmul.mubr.msk.f32.vlgmr.msra.gmra.mrb[0].mxu1 %vm590_vm1, %v2096_v58 }
 0x3bd   : > { %2312 = vmatprep.mubr.msk.f32.mxu1 %vm590_vm1, %v2097_v59 }
 0x3c0   : > { %2313 = vmatmul.mubr.msk.f32.gmra.mrb[2].mxu1 %vm590_vm1, %v2098_v60 }
 0x3c1   : > { %2315 = vmatprep.mubr.msk.f32.mxu1 %vm590_vm1, %v2099_v61 }
 0x3c4   : > { %2316 = vmatmul.mubr.msk.f32.gmra.mrb[4].mxu1 %vm590_vm1, %v2100_v62 }
 0x3c5   : > { %2318 = vmatprep.mubr.msk.f32.mxu1 %vm590_vm1, %v2101_v63 }
 0x3c8   : > { %2319 = vmatmul.mubr.msk.f32.gmra.mrb[6].mxu1 %vm590_vm1, %v2102_v43 }
 0x3c9   : > { %2337 = vmatprep.mubr.msk.f32.mxu1 %vm2581_vm2, %v2582_v0 }
 0x48f   : > { %v2311_v2 = vpop.f32.mrb[0].mxu1 }
 0x490   : > { %v2436_v38 = vadd.f32 %v2311_v2, %v327_v44  ;;  %v1809_v3 = vpop.f32.mrb[1].mxu1 }
 0x491   : > { %v2437_v4 = vadd.f32 %v1809_v3, %v326_v1 }
 0x492   : > { %v1857_v7 = vmax.f32 %v2436_v38, 0.0 }
 0x493   : > { %v1856_v8 = vmax.f32 %v2437_v4, 0.0  ;;  %v2314_v10 = vpop.f32.mrb[2].mxu1 }
 0x494   : > { %v2438_v11 = vadd.f32 %v2314_v10, %v329_v5  ;;  %v1819_v50 = vpop.f32.mrb[3].mxu1 }
 0x495   : > { %v2425_v12 = vpack.c.bf16 %v1857_v7, %v1856_v8  ;;  %v2439_v13 = vadd.f32 %v1819_v50, %v328_v48 }
 0x496   : > { %v1859_v15 = vmax.f32 %v2438_v11, 0.0 }
 0x497   : > { %v1858_v9 = vmax.f32 %v2439_v13, 0.0  ;;  %v2317_v6 = vpop.f32.mrb[4].mxu1  ;;  %2426 = vmatpush3.bf16.msra.mxu1 %v2425_v12 }
 0x498   : > { %v2440_v17 = vadd.f32 %v2317_v6, %v331_v14  ;;  %v1829_v18 = vpop.f32.mrb[5].mxu1  ;;  %2427 = vmatprep.subr.bf16.mxu1 %v2580_v54 }
 0x499   : > { %v2428_v20 = vpack.c.bf16 %v1859_v15, %v1858_v9  ;;  %v2441_v21 = vadd.f32 %v1829_v18, %v330_v16 }
 0x49a   : > { %v1861_v23 = vmax.f32 %v2440_v17, 0.0 }
 0x49b   : > { %v1860_v26 = vmax.f32 %v2441_v21, 0.0  ;;  %v2320_v27 = vpop.f32.mrb[6].mxu1  ;;  %2429 = vmatpush3.bf16.msra.mxu1 %v2428_v20 }
 0x49c   : > { %v2442_v28 = vadd.f32 %v2320_v27, %v333_v22  ;;  %v1839_v29 = vpop.f32.mrb[7].mxu1  ;;  %2430 = vmatprep.subr.bf16.mxu1 %v2580_v54 }
 0x49d   : > { %v2431_v30 = vpack.c.bf16 %v1861_v23, %v1860_v26  ;;  %v2443_v31 = vadd.f32 %v1839_v29, %v332_v25 }
 0x49e   : > { %v1863_v32 = vmax.f32 %v2442_v28, 0.0 }
 0x49f   : > { %v1862_v33 = vmax.f32 %v2443_v31, 0.0  ;;  %2432 = vmatpush3.bf16.msra.mxu1 %v2431_v30 }
 0x4a0   : > { %2433 = vmatprep.subr.bf16.mxu1 %v2580_v54 }
 0x4a1   : > { %v2434_v24 = vpack.c.bf16 %v1863_v32, %v1862_v33 }
 0x4a3   : > { %2435 = vmatpush3.bf16.msra.mxu1 %v2434_v24 }
 0x4a6   : > { %2338 = vmatmul.mubr.msk.f32.vlgmr.msra.gmra.mrb[8].mxu1 %vm1866_vm3, %v1864_v34 }
 0x579   : > { %v1936_v36 = vpop.f32.mrb[8].mxu1 }
 0x57a   : > { %v1937_v37 = vadd.f32 %v1936_v36, %v1865_v35  ;;  %v2339_v19 = vpop.f32.mrb[9].mxu1 }
 0x57c   : > { %1941 = vst.msk [vmem:[%s324_s18] sm:$0x3] %vm1940_vm4, %v1937_v37 }
 0x57d PF: > { %s19_s30 = sadd.s32 1, %s2566_s30  }
 0x57e   : > { %p16_p4 = scmp.ge.s32.totalorder %s19_s30, 6  }
 0x580   :  { %18 = sbr.rel (!%p16_p4) target bundleno = 1 (0x1), region = 111 }

</bundles_post_ra>
